<compile_context>
chip_gen: v7x
topology: tpu7x:2x2x1
jax: 0.10.0
libtpu: 0.0.40
codegen_flags: <defaults>
</compile_context>

<pallas_src>
import functools

import jax
import jax.numpy as jnp
from jax.experimental import pallas as pl
from jax.experimental.pallas import tpu as pltpu


NEG_SLOPE = 0.2
HIDDEN = 512
OUT_LANES = 128          # lane-dense final layer; validity lives in column 0


def _leaky_relu(x):
    return jnp.where(x > 0, x, NEG_SLOPE * x)


def _round_up(x, m):
    return (x + m - 1) // m * m


def discriminator_kernel(img_ref, cb_ref,
                         w1_ref, w2_ref, b2_ref,
                         w3_ref, b3_ref, w4_ref, b4_ref, out_ref):
    """One batch tile: 4 MXU matmuls (bf16 operands, f32 accumulation) + f32 VPU elementwise."""
    # Layer 1: img @ W1_img + (class contribution + b1), K padded to a multiple of 128.
    h = jnp.dot(img_ref[...], w1_ref[...], preferred_element_type=jnp.float32)
    h = _leaky_relu(h + cb_ref[...])                                     # (TB, 512) f32

    # Layer 2 (Dropout(0.4) -> identity at inference).
    h = jnp.dot(h.astype(jnp.bfloat16), w2_ref[...],
                preferred_element_type=jnp.float32) + b2_ref[...]
    h = _leaky_relu(h)                                                   # (TB, 512) f32

    # Layer 3 (Dropout(0.4) -> identity at inference).
    h = jnp.dot(h.astype(jnp.bfloat16), w3_ref[...],
                preferred_element_type=jnp.float32) + b3_ref[...]
    h = _leaky_relu(h)                                                   # (TB, 512) f32

    # Layer 4: lane-dense padded 512 -> 128 (validity = column 0).
    out = jnp.dot(h.astype(jnp.bfloat16), w4_ref[...],
                  preferred_element_type=jnp.float32) + b4_ref[...]
    out_ref[...] = out.astype(out_ref.dtype)                             # (TB, 128)


@functools.partial(jax.jit, static_argnames=("out_size", "block_batch"))
def discriminator_forward(img, labels, params, *, out_size, block_batch=256):
    """img: (B, out_size) float32, labels: (B,) int32 -> (B, 1) float32 validity."""
    B = img.shape[0]
    TB = _round_up(min(block_batch, _round_up(B, 8)), 8)    # batch tile (multiple of 8)
    Bp = _round_up(B, TB)
    Kp = _round_up(out_size, OUT_LANES)                     # lane-dense K for layer 1

    w1 = params["w1"]                                       # (out_size + n_classes, 512)

    # Fold Embedding + concat + b1 into a (n_classes, 512) per-class table, then gather rows.
    class_contrib = jnp.dot(params["emb"], w1[out_size:]) + params["b1"]  # (n_classes, 512) f32
    cb_rows = class_contrib[labels]                                        # (B, 512) f32

    # Layer-1 weight: zero-pad K (out_size -> Kp); zero rows contribute nothing.
    w1_img = jnp.zeros((Kp, HIDDEN), jnp.bfloat16).at[:out_size].set(
        w1[:out_size].astype(jnp.bfloat16))

    # Lane-dense final layer: zero-pad (512, 1) -> (512, 128).
    w4p = jnp.zeros((HIDDEN, OUT_LANES), jnp.bfloat16).at[:, :1].set(
        params["w4"].astype(jnp.bfloat16))
    b4p = jnp.zeros((1, OUT_LANES), jnp.float32).at[:, :1].set(params["b4"])

    # Pad img to (Bp, Kp) bf16; pad class rows to (Bp, 512).
    img_bf = jnp.zeros((Bp, Kp), jnp.bfloat16).at[:B, :out_size].set(
        img.astype(jnp.bfloat16))
    if Bp != B:
        cb_rows = jnp.pad(cb_rows, ((0, Bp - B), (0, 0)))

    w2 = params["w2"].astype(jnp.bfloat16)
    w3 = params["w3"].astype(jnp.bfloat16)

    const = lambda shape: pl.BlockSpec(shape, lambda i: (0,) * len(shape))  # VMEM-resident
    batch = lambda shape: pl.BlockSpec(shape, lambda i: (i, 0))             # per-batch-tile

    out = pl.pallas_call(
        discriminator_kernel,
        out_shape=jax.ShapeDtypeStruct((Bp, OUT_LANES), jnp.float32),
        grid=(Bp // TB,),
        in_specs=[
            batch((TB, Kp)),              # img tile (K-padded)            (bf16)
            batch((TB, HIDDEN)),          # class contribution + b1        (f32)
            const((Kp, HIDDEN)),          # W1[:out_size] padded           (bf16, resident)
            const((HIDDEN, HIDDEN)),      # W2                             (bf16, resident)
            const((1, HIDDEN)),           # b2                             (f32)
            const((HIDDEN, HIDDEN)),      # W3                             (bf16, resident)
            const((1, HIDDEN)),           # b3
            const((HIDDEN, OUT_LANES)),   # W4 padded                      (bf16, resident)
            const((1, OUT_LANES)),        # b4 padded
        ],
        out_specs=batch((TB, OUT_LANES)),
        compiler_params=pltpu.CompilerParams(
            dimension_semantics=("parallel",)),   # batch tiles shard across v7x TCs
    )(img_bf, cb_rows, w1_img, w2, params["b2"], w3, params["b3"], w4p, b4p)

    return out[:B, :1]


def init_params(key, n_classes, out_size, hidden=HIDDEN):
    """Deterministic synthetic params; PyTorch-style U(-1/sqrt(fan_in), 1/sqrt(fan_in))."""
    ks = jax.random.split(key, 9)

    def linear(kw, kb, fan_in, fan_out):
        bound = 1.0 / jnp.sqrt(jnp.float32(fan_in))
        w = jax.random.uniform(kw, (fan_in, fan_out), jnp.float32, -bound, bound)
        b = jax.random.uniform(kb, (1, fan_out), jnp.float32, -bound, bound)
        return w, b

    d_in = n_classes + out_size
    w1, b1 = linear(ks[0], ks[1], d_in, hidden)
    w2, b2 = linear(ks[2], ks[3], hidden, hidden)
    w3, b3 = linear(ks[4], ks[5], hidden, hidden)
    w4, b4 = linear(ks[6], ks[7], hidden, 1)
    emb = jax.random.normal(ks[8], (n_classes, n_classes), jnp.float32)  # nn.Embedding ~ N(0,1)
    return dict(emb=emb, w1=w1, b1=b1, w2=w2, b2=b2, w3=w3, b3=b3, w4=w4, b4=b4)


def reference_forward_f32(img, labels, params):
    """Pure-f32 JAX reference of the original PyTorch forward (eval mode)."""
    d_in = jnp.concatenate([img, params["emb"][labels]], axis=-1)
    h = jax.nn.leaky_relu(d_in @ params["w1"] + params["b1"], NEG_SLOPE)
    h = jax.nn.leaky_relu(h @ params["w2"] + params["b2"], NEG_SLOPE)
    h = jax.nn.leaky_relu(h @ params["w3"] + params["b3"], NEG_SLOPE)
    return h @ params["w4"] + params["b4"]


def reference_forward_bf16(img, labels, params, out_size):
    """Same bf16-operand / f32-accumulate math the kernel performs (apples-to-apples check)."""
    w1 = params["w1"]
    cb = (params["emb"] @ w1[out_size:] + params["b1"])[labels]
    h = jnp.dot(img.astype(jnp.bfloat16), w1[:out_size].astype(jnp.bfloat16),
                preferred_element_type=jnp.float32) + cb
    h = jax.nn.leaky_relu(h, NEG_SLOPE)
    for wk, bk in (("w2", "b2"), ("w3", "b3")):
        h = jnp.dot(h.astype(jnp.bfloat16), params[wk].astype(jnp.bfloat16),
                    preferred_element_type=jnp.float32) + params[bk]
        h = jax.nn.leaky_relu(h, NEG_SLOPE)
    return jnp.dot(h.astype(jnp.bfloat16), params["w4"].astype(jnp.bfloat16),
                   preferred_element_type=jnp.float32) + params["b4"]


if __name__ == "__main__":
    key = jax.random.PRNGKey(0)
    k_img, k_lab, k_par = jax.random.split(key, 3)

    n_classes = 10   # opt.n_classes
    out_size = 54    # adata.shape[1] (synthetic)
    batch = 64       # small demo batch; block_batch=32 exercises a 2-step tiled grid

    img = jax.random.normal(k_img, (batch, out_size), jnp.float32)
    labels = jax.random.randint(k_lab, (batch,), 0, n_classes, jnp.int32)
    params = init_params(k_par, n_classes, out_size)

    validity = discriminator_forward(img, labels, params,
                                     out_size=out_size, block_batch=32)
    validity = jax.block_until_ready(validity)
    assert validity.shape == (batch, 1)

    # Tight check against the bf16-matched reference; loose check against pure-f32 math.
    ref_bf16 = reference_forward_bf16(img, labels, params, out_size)
    ref_f32 = reference_forward_f32(img, labels, params)
    assert jnp.allclose(validity, ref_bf16, atol=1e-3, rtol=1e-3)
    assert jnp.allclose(validity, ref_f32, atol=5e-2, rtol=5e-2)

    print("KERNEL_OK")
</pallas_src>

<mosaic_0001>
module attributes {stable_mosaic.version = 11 : i64} {
  func.func @discriminator_kernel(%arg0: i32, %arg1: memref<32x128xbf16, #tpu.memory_space<vmem>>, %arg2: memref<32x512xf32, #tpu.memory_space<vmem>>, %arg3: memref<128x512xbf16, #tpu.memory_space<vmem>>, %arg4: memref<512x512xbf16, #tpu.memory_space<vmem>>, %arg5: memref<1x512xf32, #tpu.memory_space<vmem>>, %arg6: memref<512x512xbf16, #tpu.memory_space<vmem>>, %arg7: memref<1x512xf32, #tpu.memory_space<vmem>>, %arg8: memref<512x128xbf16, #tpu.memory_space<vmem>>, %arg9: memref<1x128xf32, #tpu.memory_space<vmem>>, %arg10: memref<32x128xf32, #tpu.memory_space<vmem>>) attributes {dimension_semantics = [#tpu.dimension_semantics<parallel>], iteration_bounds = array<i64: 2>, scalar_prefetch = 0 : i64, scratch_operands = 0 : i64, tpu.core_type = #tpu.core_type<tc>, window_params = [{transform_indices = @transform_0, window_bounds = array<i64: 32, 128>}, {transform_indices = @transform_1, window_bounds = array<i64: 32, 512>}, {pipeline_mode = #tpu.pipeline_mode<synchronous>, transform_indices = @transform_2, window_bounds = array<i64: 128, 512>}, {pipeline_mode = #tpu.pipeline_mode<synchronous>, transform_indices = @transform_3, window_bounds = array<i64: 512, 512>}, {pipeline_mode = #tpu.pipeline_mode<synchronous>, transform_indices = @transform_4, window_bounds = array<i64: 1, 512>}, {pipeline_mode = #tpu.pipeline_mode<synchronous>, transform_indices = @transform_5, window_bounds = array<i64: 512, 512>}, {pipeline_mode = #tpu.pipeline_mode<synchronous>, transform_indices = @transform_6, window_bounds = array<i64: 1, 512>}, {pipeline_mode = #tpu.pipeline_mode<synchronous>, transform_indices = @transform_7, window_bounds = array<i64: 512, 128>}, {pipeline_mode = #tpu.pipeline_mode<synchronous>, transform_indices = @transform_8, window_bounds = array<i64: 1, 128>}, {transform_indices = @transform_9, window_bounds = array<i64: 32, 128>}]} {
    %c0 = arith.constant 0 : index
    %c0_0 = arith.constant 0 : index
    %0 = vector.load %arg1[%c0, %c0_0] : memref<32x128xbf16, #tpu.memory_space<vmem>>, vector<32x128xbf16>
    %c0_1 = arith.constant 0 : index
    %c0_2 = arith.constant 0 : index
    %1 = vector.load %arg3[%c0_1, %c0_2] : memref<128x512xbf16, #tpu.memory_space<vmem>>, vector<128x512xbf16>
    %cst = arith.constant dense<0.000000e+00> : vector<32x512xf32>
    %2 = tpu.matmul %0, %1, %cst {dimension_numbers = #tpu.dot_dimension_numbers<[1], [0], [0], [1], [0, 0, 1, 1], [], []>} : vector<32x128xbf16>, vector<128x512xbf16>, vector<32x512xf32> -> vector<32x512xf32>
    %c0_3 = arith.constant 0 : index
    %c0_4 = arith.constant 0 : index
    %3 = vector.load %arg2[%c0_3, %c0_4] : memref<32x512xf32, #tpu.memory_space<vmem>>, vector<32x512xf32>
    %4 = arith.addf %2, %3 : vector<32x512xf32>
    %cst_5 = arith.constant 0.000000e+00 : f32
    %5 = vector.broadcast %cst_5 : f32 to vector<32x512xf32>
    %6 = arith.cmpf ogt, %4, %5 : vector<32x512xf32>
    %cst_6 = arith.constant 2.000000e-01 : f32
    %7 = vector.broadcast %cst_6 : f32 to vector<32x512xf32>
    %8 = arith.mulf %7, %4 : vector<32x512xf32>
    %9 = arith.select %6, %4, %8 : vector<32x512xi1>, vector<32x512xf32>
    %10 = arith.truncf %9 : vector<32x512xf32> to vector<32x512xbf16>
    %c0_7 = arith.constant 0 : index
    %c0_8 = arith.constant 0 : index
    %11 = vector.load %arg4[%c0_7, %c0_8] : memref<512x512xbf16, #tpu.memory_space<vmem>>, vector<512x512xbf16>
    %cst_9 = arith.constant dense<0.000000e+00> : vector<32x512xf32>
    %12 = tpu.matmul %10, %11, %cst_9 {dimension_numbers = #tpu.dot_dimension_numbers<[1], [0], [0], [1], [0, 0, 1, 1], [], []>} : vector<32x512xbf16>, vector<512x512xbf16>, vector<32x512xf32> -> vector<32x512xf32>
    %c0_10 = arith.constant 0 : index
    %c0_11 = arith.constant 0 : index
    %13 = vector.load %arg5[%c0_10, %c0_11] : memref<1x512xf32, #tpu.memory_space<vmem>>, vector<1x512xf32>
    %14 = vector.broadcast %13 : vector<1x512xf32> to vector<32x512xf32>
    %15 = arith.addf %12, %14 : vector<32x512xf32>
    %cst_12 = arith.constant 0.000000e+00 : f32
    %16 = vector.broadcast %cst_12 : f32 to vector<32x512xf32>
    %17 = arith.cmpf ogt, %15, %16 : vector<32x512xf32>
    %cst_13 = arith.constant 2.000000e-01 : f32
    %18 = vector.broadcast %cst_13 : f32 to vector<32x512xf32>
    %19 = arith.mulf %18, %15 : vector<32x512xf32>
    %20 = arith.select %17, %15, %19 : vector<32x512xi1>, vector<32x512xf32>
    %21 = arith.truncf %20 : vector<32x512xf32> to vector<32x512xbf16>
    %c0_14 = arith.constant 0 : index
    %c0_15 = arith.constant 0 : index
    %22 = vector.load %arg6[%c0_14, %c0_15] : memref<512x512xbf16, #tpu.memory_space<vmem>>, vector<512x512xbf16>
    %cst_16 = arith.constant dense<0.000000e+00> : vector<32x512xf32>
    %23 = tpu.matmul %21, %22, %cst_16 {dimension_numbers = #tpu.dot_dimension_numbers<[1], [0], [0], [1], [0, 0, 1, 1], [], []>} : vector<32x512xbf16>, vector<512x512xbf16>, vector<32x512xf32> -> vector<32x512xf32>
    %c0_17 = arith.constant 0 : index
    %c0_18 = arith.constant 0 : index
    %24 = vector.load %arg7[%c0_17, %c0_18] : memref<1x512xf32, #tpu.memory_space<vmem>>, vector<1x512xf32>
    %25 = vector.broadcast %24 : vector<1x512xf32> to vector<32x512xf32>
    %26 = arith.addf %23, %25 : vector<32x512xf32>
    %cst_19 = arith.constant 0.000000e+00 : f32
    %27 = vector.broadcast %cst_19 : f32 to vector<32x512xf32>
    %28 = arith.cmpf ogt, %26, %27 : vector<32x512xf32>
    %cst_20 = arith.constant 2.000000e-01 : f32
    %29 = vector.broadcast %cst_20 : f32 to vector<32x512xf32>
    %30 = arith.mulf %29, %26 : vector<32x512xf32>
    %31 = arith.select %28, %26, %30 : vector<32x512xi1>, vector<32x512xf32>
    %32 = arith.truncf %31 : vector<32x512xf32> to vector<32x512xbf16>
    %c0_21 = arith.constant 0 : index
    %c0_22 = arith.constant 0 : index
    %33 = vector.load %arg8[%c0_21, %c0_22] : memref<512x128xbf16, #tpu.memory_space<vmem>>, vector<512x128xbf16>
    %cst_23 = arith.constant dense<0.000000e+00> : vector<32x128xf32>
    %34 = tpu.matmul %32, %33, %cst_23 {dimension_numbers = #tpu.dot_dimension_numbers<[1], [0], [0], [1], [0, 0, 1, 1], [], []>} : vector<32x512xbf16>, vector<512x128xbf16>, vector<32x128xf32> -> vector<32x128xf32>
    %c0_24 = arith.constant 0 : index
    %c0_25 = arith.constant 0 : index
    %35 = vector.load %arg9[%c0_24, %c0_25] : memref<1x128xf32, #tpu.memory_space<vmem>>, vector<1x128xf32>
    %36 = vector.broadcast %35 : vector<1x128xf32> to vector<32x128xf32>
    %37 = arith.addf %34, %36 : vector<32x128xf32>
    %c0_26 = arith.constant 0 : index
    %c0_27 = arith.constant 0 : index
    %38 = vector.load %arg10[%c0_26, %c0_27] : memref<32x128xf32, #tpu.memory_space<vmem>>, vector<32x128xf32>
    tpu.vector_store %arg10[%c0_26, %c0_27], %37 {strides = array<i32>} : memref<32x128xf32, #tpu.memory_space<vmem>>, vector<32x128xf32>,
    return
  }
  func.func @transform_0(%arg0: i32) -> (i32, i32) {
    %c0_i32 = arith.constant 0 : i32
    %c0_i32_0 = arith.constant 0 : i32
    return %arg0, %c0_i32 : i32, i32
  }
  func.func @transform_1(%arg0: i32) -> (i32, i32) {
    %c0_i32 = arith.constant 0 : i32
    %c0_i32_0 = arith.constant 0 : i32
    return %arg0, %c0_i32 : i32, i32
  }
  func.func @transform_2(%arg0: i32) -> (i32, i32) {
    %c0_i32 = arith.constant 0 : i32
    %c0_i32_0 = arith.constant 0 : i32
    %c0_i32_1 = arith.constant 0 : i32
    return %c0_i32, %c0_i32_0 : i32, i32
  }
  func.func @transform_3(%arg0: i32) -> (i32, i32) {
    %c0_i32 = arith.constant 0 : i32
    %c0_i32_0 = arith.constant 0 : i32
    %c0_i32_1 = arith.constant 0 : i32
    return %c0_i32, %c0_i32_0 : i32, i32
  }
  func.func @transform_4(%arg0: i32) -> (i32, i32) {
    %c0_i32 = arith.constant 0 : i32
    %c0_i32_0 = arith.constant 0 : i32
    %c0_i32_1 = arith.constant 0 : i32
    return %c0_i32, %c0_i32_0 : i32, i32
  }
  func.func @transform_5(%arg0: i32) -> (i32, i32) {
    %c0_i32 = arith.constant 0 : i32
    %c0_i32_0 = arith.constant 0 : i32
    %c0_i32_1 = arith.constant 0 : i32
    return %c0_i32, %c0_i32_0 : i32, i32
  }
  func.func @transform_6(%arg0: i32) -> (i32, i32) {
    %c0_i32 = arith.constant 0 : i32
    %c0_i32_0 = arith.constant 0 : i32
    %c0_i32_1 = arith.constant 0 : i32
    return %c0_i32, %c0_i32_0 : i32, i32
  }
  func.func @transform_7(%arg0: i32) -> (i32, i32) {
    %c0_i32 = arith.constant 0 : i32
    %c0_i32_0 = arith.constant 0 : i32
    %c0_i32_1 = arith.constant 0 : i32
    return %c0_i32, %c0_i32_0 : i32, i32
  }
  func.func @transform_8(%arg0: i32) -> (i32, i32) {
    %c0_i32 = arith.constant 0 : i32
    %c0_i32_0 = arith.constant 0 : i32
    %c0_i32_1 = arith.constant 0 : i32
    return %c0_i32, %c0_i32_0 : i32, i32
  }
  func.func @transform_9(%arg0: i32) -> (i32, i32) {
    %c0_i32 = arith.constant 0 : i32
    %c0_i32_0 = arith.constant 0 : i32
    return %arg0, %c0_i32 : i32, i32
  }
}

</mosaic_0001>

<bundles_post_ra>
// kernel: discriminator_forward.1
= control target key start
LH: loop header
LB: loop body
LE: loop exit
PB: predicated region body
PF: predicated region fallthrough
CT: control target
= control target key end

     0   :  { %s4289_s30 = smov 0   ;;  %s5425_s0 = inlined_call_operand.vmem [shape: bf16[64,128], index: 0, kind: input, shape index: {}]   ;;  %s5426_s1 = inlined_call_operand.vmem [shape: f32[64,512], index: 1, kind: input, shape index: {}]   ;;  %s5427_s2 = inlined_call_operand.vmem [shape: bf16[128,512], index: 2, kind: input, shape index: {}]   ;;  %s5428_s3 = inlined_call_operand.vmem [shape: bf16[512,512], index: 3, kind: input, shape index: {}]   ;;  %s5429_s4 = inlined_call_operand.vmem [shape: f32[1,512], index: 4, kind: input, shape index: {}]   ;;  %s5430_s5 = inlined_call_operand.vmem [shape: bf16[512,512], index: 5, kind: input, shape index: {}]   ;;  %s5431_s6 = inlined_call_operand.vmem [shape: f32[1,512], index: 6, kind: input, shape index: {}]   ;;  %s5432_s7 = inlined_call_operand.vmem [shape: bf16[512,128], index: 7, kind: input, shape index: {}]   ;;  %s5433_s8 = inlined_call_operand.vmem [shape: f32[1,128], index: 8, kind: input, shape index: {}]   ;;  %s5434_s9 = inlined_call_operand.vmem [shape: f32[64,128], index: 9, kind: output, shape index: {}]  }
   0x1 LB: > { %s3297_s10 = sadd.s32 4294967295, %s4236_s30   ;;  %p3301_p0 = scmp.ge.s32.totalorder %s4236_s30, 1  ;;  %s4236_s30 = sphi %s4289_s30, %s19_s30  }
   0x2   : > { %p300_p1 = scmp.lt.s32.totalorder %s4236_s30, 3 }
   0x4   : > { %p301_p2 = pnand %p3301_p0, %p300_p1 }
   0x5   : > { %v3764_v0 = vld [vmem:[%s5427_s2 + $0x4] ss:$16 sps:$4 sm:$0xff] (!%p301_p2)   ;;  %s3302_s13 = sshll.u32 (!%p301_p2), %s3297_s10, 2  ;;  %v3766_v1 = vld [vmem:[%s5427_s2] ss:$16 sps:$4 sm:$0xff] (!%p301_p2)   ;;  %v4238_v2 = vmov (!%p301_p2), 0  }
   0x6   : > { %304 = sbr.rel (%p301_p2) target bundleno = 1076 (0x434), region = 56  ;;  %618 = vmatprep.mubr.bf16.mxu0 (!%p301_p2), %v4238_v2  ;;  %p343_p3 = scmp.lt.s32.totalorder (!%p301_p2), %s3302_s13, 7  ;;  %671 = vmatprep.mubr.bf16.mxu1 (!%p301_p2), %v4238_v2  ;;  %v3767_v3 = vld [vmem:[%s5427_s2 + $0x24] ss:$16 sps:$4 sm:$0xff] (!%p301_p2)   ;;  %v3769_v4 = vld [vmem:[%s5427_s2 + $0x20] ss:$16 sps:$4 sm:$0xff] (!%p301_p2)  }
   0x7   : > { %586 = vmatprep.subr.bf16.mxu0 (!%p301_p2), %v3764_v0  ;;  %v3770_v5 = vld [vmem:[%s5427_s2 + $0x44] ss:$16 sps:$4 sm:$0xff] (!%p301_p2)   ;;  %v3772_v6 = vld [vmem:[%s5427_s2 + $0x40] ss:$16 sps:$4 sm:$0xff] (!%p301_p2)   ;;  %v3789_v10 = vld [vmem:[%s5427_s2 + $0xc] ss:$16 sps:$4 sm:$0xff] (!%p301_p2)  }
   0x8   : > { %587 = vmatpush1.bf16.msra.mxu0 (!%p301_p2), %v3766_v1  ;;  %v3773_v7 = vld [vmem:[%s5427_s2 + $0x64] ss:$16 sps:$4 sm:$0xff] (!%p301_p2)   ;;  %v3775_v8 = vld [vmem:[%s5427_s2 + $0x60] ss:$16 sps:$4 sm:$0xff] (!%p301_p2)   ;;  %v3791_v11 = vld [vmem:[%s5427_s2 + $0x8] ss:$16 sps:$4 sm:$0xff] (!%p301_p2)   ;;  %639 = vmatprep.subr.bf16.mxu1 (!%p301_p2), %v3789_v10 }
   0x9   : > { %588 = vmatprep.subr.bf16.mxu0 (!%p301_p2), %v3767_v3  ;;  %v3776_v9 = vld [vmem:[%s5427_s2 + $0x84] ss:$16 sps:$4 sm:$0xff] (!%p301_p2)   ;;  %v3792_v12 = vld [vmem:[%s5427_s2 + $0x2c] ss:$16 sps:$4 sm:$0xff] (!%p301_p2)   ;;  %v3778_v13 = vld [vmem:[%s5427_s2 + $0x80] ss:$16 sps:$4 sm:$0xff] (!%p301_p2)   ;;  %640 = vmatpush1.bf16.msra.mxu1 (!%p301_p2), %v3791_v11 }
   0xa   : > { %v3794_v14 = vld [vmem:[%s5427_s2 + $0x28] ss:$16 sps:$4 sm:$0xff] (!%p301_p2)   ;;  %v3779_v15 = vld [vmem:[%s5427_s2 + $0xa4] ss:$16 sps:$4 sm:$0xff] (!%p301_p2)   ;;  %641 = vmatprep.subr.bf16.mxu1 (!%p301_p2), %v3792_v12  ;;  %v3795_v16 = vld [vmem:[%s5427_s2 + $0x4c] ss:$16 sps:$4 sm:$0xff] (!%p301_p2)  }
   0xb   : > { %v3781_v17 = vld [vmem:[%s5427_s2 + $0xa0] ss:$16 sps:$4 sm:$0xff] (!%p301_p2)   ;;  %v3782_v18 = vld [vmem:[%s5427_s2 + $0xc4] ss:$16 sps:$4 sm:$0xff] (!%p301_p2)   ;;  %v3797_v19 = vld [vmem:[%s5427_s2 + $0x48] ss:$16 sps:$4 sm:$0xff] (!%p301_p2)  }
   0xc   : > { %589 = vmatpush1.bf16.msra.mxu0 (!%p301_p2), %v3769_v4  ;;  %v3798_v20 = vld [vmem:[%s5427_s2 + $0x6c] ss:$16 sps:$4 sm:$0xff] (!%p301_p2)   ;;  %v3784_v21 = vld [vmem:[%s5427_s2 + $0xc0] ss:$16 sps:$4 sm:$0xff] (!%p301_p2)   ;;  %v3800_v22 = vld [vmem:[%s5427_s2 + $0x68] ss:$16 sps:$4 sm:$0xff] (!%p301_p2)  }
   0xd   : > { %s5436_s13 = smov (!%p343_p3, %s3302_s13), 7  ;;  %590 = vmatprep.subr.bf16.mxu0 %v3770_v5  ;;  %642 = vmatpush1.bf16.msra.mxu1 %v3794_v14  ;;  %v3785_v23 = vld [vmem:[%s5427_s2 + $0xe4] ss:$16 sps:$4 sm:$0xff]   ;;  %v3801_v24 = vld [vmem:[%s5427_s2 + $0x8c] ss:$16 sps:$4 sm:$0xff]  }
   0xe   : > { %s3303_s22 = sshll.u32 %s5436_s13, 2  ;;  %643 = vmatprep.subr.bf16.mxu1 %v3795_v16  ;;  %v3787_v25 = vld [vmem:[%s5427_s2 + $0xe0] ss:$16 sps:$4 sm:$0xff]   ;;  %v3803_v26 = vld [vmem:[%s5427_s2 + $0x88] ss:$16 sps:$4 sm:$0xff]   ;;  %s3634_s24 = sshll.u32 %s5436_s13, 5 }
   0xf   : > { %s4326_s29 = scalar_lea.vmem %s5425_s0, %s3303_s22  ;;  %v3804_v27 = vld [vmem:[%s5427_s2 + $0xac] ss:$16 sps:$4 sm:$0xff]   ;;  %v3816_v28 = vld [vmem:[%s5428_s3 + $0x4] ss:$16 sps:$4 sm:$0xff]   ;;  %v3806_v30 = vld [vmem:[%s5427_s2 + $0xa8] ss:$16 sps:$4 sm:$0xff]   ;;  %s4609_s27 = scalar_lea.vmem %s5426_s1, %s3634_s24 }
  0x10   : > { %591 = vmatpush1.bf16.msra.mxu0 %v3772_v6  ;;  %v3788_v29 = vld [vmem:[%s4326_s29] sm:$0xff]   ;;  %v3808_v31 = vld [vmem:[%s5427_s2 + $0xcc] ss:$16 sps:$4 sm:$0xff]   ;;  %v3810_v34 = vld [vmem:[%s5427_s2 + $0xc8] ss:$16 sps:$4 sm:$0xff]   ;;  %s3308_s23 = sshll.u32 %s5436_s13, 3 }
  0x11   : > { %592 = vmatprep.subr.bf16.mxu0 %v3773_v7  ;;  %644 = vmatpush1.bf16.msra.mxu1 %v3797_v19  ;;  %v3814_v32 = vld [vmem:[%s5428_s3] ss:$16 sps:$4 sm:$0xff]   ;;  %v3822_v33 = vld [vmem:[%s5428_s3 + $0x24] ss:$16 sps:$4 sm:$0xff]   ;;  %v3811_v35 = vld [vmem:[%s5427_s2 + $0xec] ss:$16 sps:$4 sm:$0xff]   ;;  %s359_s25 = scalar_lea.vmem %s5434_s9, %s3308_s23 }
  0x12   : > { %645 = vmatprep.subr.bf16.mxu1 %v3798_v20  ;;  %v3820_v36 = vld [vmem:[%s5428_s3 + $0x20] ss:$16 sps:$4 sm:$0xff]   ;;  %v3828_v37 = vld [vmem:[%s5428_s3 + $0x44] ss:$16 sps:$4 sm:$0xff]   ;;  %v3807_v38 = vld [vmem:[%s4326_s29 + $0x8] sm:$0xff]  }
  0x13   : > { %v3813_v39 = vld [vmem:[%s5427_s2 + $0xe8] ss:$16 sps:$4 sm:$0xff]   ;;  %v3819_v40 = vld [vmem:[%s5428_s3 + $0xc] ss:$16 sps:$4 sm:$0xff]   ;;  %v3826_v41 = vld [vmem:[%s5428_s3 + $0x40] ss:$16 sps:$4 sm:$0xff]  }
  0x14   : > { %593 = vmatpush1.bf16.msra.mxu0 %v3775_v8  ;;  %v3834_v42 = vld [vmem:[%s5428_s3 + $0x64] ss:$16 sps:$4 sm:$0xff]   ;;  %v3817_v43 = vld [vmem:[%s5428_s3 + $0x8] ss:$16 sps:$4 sm:$0xff]   ;;  %v3825_v44 = vld [vmem:[%s5428_s3 + $0x2c] ss:$16 sps:$4 sm:$0xff]  }
  0x15   : > { %594 = vmatprep.subr.bf16.mxu0 %v3776_v9  ;;  %646 = vmatpush1.bf16.msra.mxu1 %v3800_v22  ;;  %v3832_v45 = vld [vmem:[%s5428_s3 + $0x60] ss:$16 sps:$4 sm:$0xff]   ;;  %v3840_v46 = vld [vmem:[%s5428_s3 + $0x84] ss:$16 sps:$4 sm:$0xff]   ;;  %v3823_v47 = vld [vmem:[%s5428_s3 + $0x28] ss:$16 sps:$4 sm:$0xff]  }
  0x16   : > { %647 = vmatprep.subr.bf16.mxu1 %v3801_v24  ;;  %v3831_v48 = vld [vmem:[%s5428_s3 + $0x4c] ss:$16 sps:$4 sm:$0xff]   ;;  %v3838_v49 = vld [vmem:[%s5428_s3 + $0x80] ss:$16 sps:$4 sm:$0xff]   ;;  %v3846_v50 = vld [vmem:[%s5428_s3 + $0xa4] ss:$16 sps:$4 sm:$0xff]  }
  0x17   : > { %v3829_v51 = vld [vmem:[%s5428_s3 + $0x48] ss:$16 sps:$4 sm:$0xff]   ;;  %v3837_v52 = vld [vmem:[%s5428_s3 + $0x6c] ss:$16 sps:$4 sm:$0xff]   ;;  %v3844_v53 = vld [vmem:[%s5428_s3 + $0xa0] ss:$16 sps:$4 sm:$0xff]  }
  0x18   : > { %595 = vmatpush1.bf16.msra.mxu0 %v3778_v13  ;;  %v3852_v54 = vld [vmem:[%s5428_s3 + $0xc4] ss:$16 sps:$4 sm:$0xff]   ;;  %v3835_v55 = vld [vmem:[%s5428_s3 + $0x68] ss:$16 sps:$4 sm:$0xff]   ;;  %v3843_v56 = vld [vmem:[%s5428_s3 + $0x8c] ss:$16 sps:$4 sm:$0xff]  }
  0x19   : > { %596 = vmatprep.subr.bf16.mxu0 %v3779_v15  ;;  %648 = vmatpush1.bf16.msra.mxu1 %v3803_v26  ;;  %v3850_v57 = vld [vmem:[%s5428_s3 + $0xc0] ss:$16 sps:$4 sm:$0xff]   ;;  %v3858_v58 = vld [vmem:[%s5428_s3 + $0xe4] ss:$16 sps:$4 sm:$0xff]   ;;  %v3841_v59 = vld [vmem:[%s5428_s3 + $0x88] ss:$16 sps:$4 sm:$0xff]  }
  0x1a   : > { %649 = vmatprep.subr.bf16.mxu1 %v3804_v27  ;;  %v3849_v60 = vld [vmem:[%s5428_s3 + $0xac] ss:$16 sps:$4 sm:$0xff]   ;;  %v3856_v61 = vld [vmem:[%s5428_s3 + $0xe0] ss:$16 sps:$4 sm:$0xff]   ;;  %v3864_v62 = vld [vmem:[%s5428_s3 + $0x104] ss:$16 sps:$4 sm:$0xff]  }
  0x1b   : > { %v3847_v63 = vld [vmem:[%s5428_s3 + $0xa8] ss:$16 sps:$4 sm:$0xff]   ;;  %v3855_v0 = vld [vmem:[%s5428_s3 + $0xcc] ss:$16 sps:$4 sm:$0xff]   ;;  %v3862_v1 = vld [vmem:[%s5428_s3 + $0x100] ss:$16 sps:$4 sm:$0xff]  }
  0x1c   : > { %597 = vmatpush1.bf16.msra.mxu0 %v3781_v17  ;;  %v3853_v3 = vld [vmem:[%s5428_s3 + $0xc8] ss:$16 sps:$4 sm:$0xff]   ;;  %v3861_v4 = vld [vmem:[%s5428_s3 + $0xec] ss:$16 sps:$4 sm:$0xff]   ;;  %v3868_v5 = vld [vmem:[%s5428_s3 + $0x120] ss:$16 sps:$4 sm:$0xff]  }
  0x1d   : > { %598 = vmatprep.subr.bf16.mxu0 %v3782_v18  ;;  %650 = vmatpush1.bf16.msra.mxu1 %v3806_v30  ;;  %v3876_v6 = vld [vmem:[%s5428_s3 + $0x144] ss:$16 sps:$4 sm:$0xff]   ;;  %v3859_v7 = vld [vmem:[%s5428_s3 + $0xe8] ss:$16 sps:$4 sm:$0xff]   ;;  %v3867_v8 = vld [vmem:[%s5428_s3 + $0x10c] ss:$16 sps:$4 sm:$0xff]  }
  0x1e   : > { %651 = vmatprep.subr.bf16.mxu1 %v3808_v31  ;;  %v3874_v9 = vld [vmem:[%s5428_s3 + $0x140] ss:$16 sps:$4 sm:$0xff]   ;;  %v3882_v10 = vld [vmem:[%s5428_s3 + $0x164] ss:$16 sps:$4 sm:$0xff]   ;;  %v3865_v11 = vld [vmem:[%s5428_s3 + $0x108] ss:$16 sps:$4 sm:$0xff]  }
  0x1f   : > { %v3873_v12 = vld [vmem:[%s5428_s3 + $0x12c] ss:$16 sps:$4 sm:$0xff]   ;;  %v3880_v13 = vld [vmem:[%s5428_s3 + $0x160] ss:$16 sps:$4 sm:$0xff]   ;;  %v3888_v14 = vld [vmem:[%s5428_s3 + $0x184] ss:$16 sps:$4 sm:$0xff]  }
  0x20   : > { %599 = vmatpush1.bf16.msra.mxu0 %v3784_v21  ;;  %v3871_v15 = vld [vmem:[%s5428_s3 + $0x128] ss:$16 sps:$4 sm:$0xff]   ;;  %v3879_v16 = vld [vmem:[%s5428_s3 + $0x14c] ss:$16 sps:$4 sm:$0xff]   ;;  %v3886_v17 = vld [vmem:[%s5428_s3 + $0x180] ss:$16 sps:$4 sm:$0xff]  }
  0x21   : > { %600 = vmatprep.subr.bf16.mxu0 %v3785_v23  ;;  %652 = vmatpush1.bf16.msra.mxu1 %v3810_v34  ;;  %v3894_v18 = vld [vmem:[%s5428_s3 + $0x1a4] ss:$16 sps:$4 sm:$0xff]   ;;  %v3877_v19 = vld [vmem:[%s5428_s3 + $0x148] ss:$16 sps:$4 sm:$0xff]   ;;  %v3885_v20 = vld [vmem:[%s5428_s3 + $0x16c] ss:$16 sps:$4 sm:$0xff]  }
  0x22   : > { %653 = vmatprep.subr.bf16.mxu1 %v3811_v35  ;;  %v3892_v21 = vld [vmem:[%s5428_s3 + $0x1a0] ss:$16 sps:$4 sm:$0xff]   ;;  %v3883_v22 = vld [vmem:[%s5428_s3 + $0x168] ss:$16 sps:$4 sm:$0xff]   ;;  %v3891_v23 = vld [vmem:[%s5428_s3 + $0x18c] ss:$16 sps:$4 sm:$0xff]  }
  0x23   : > { %v3889_v24 = vld [vmem:[%s5428_s3 + $0x188] ss:$16 sps:$4 sm:$0xff]   ;;  %v3900_v27 = vld [vmem:[%s5428_s3 + $0x1c4] ss:$16 sps:$4 sm:$0xff]  }
  0x24   : > { %601 = vmatpush1.bf16.msra.mxu0 %v3787_v25  ;;  %v3897_v25 = vld [vmem:[%s5428_s3 + $0x1ac] ss:$16 sps:$4 sm:$0xff]   ;;  %v3895_v26 = vld [vmem:[%s5428_s3 + $0x1a8] ss:$16 sps:$4 sm:$0xff]   ;;  %v3906_v31 = vld [vmem:[%s5428_s3 + $0x1e4] ss:$16 sps:$4 sm:$0xff]  }
  0x25   : > { %1538 = vmatprep.subr.bf16.mxu0 %v3816_v28  ;;  %654 = vmatpush1.bf16.msra.mxu1 %v3813_v39  ;;  %v3903_v28 = vld [vmem:[%s5428_s3 + $0x1cc] ss:$16 sps:$4 sm:$0xff]   ;;  %v3901_v30 = vld [vmem:[%s5428_s3 + $0x1c8] ss:$16 sps:$4 sm:$0xff]   ;;  %v3912_v35 = vld [vmem:[%s5428_s3 + $0x204] ss:$16 sps:$4 sm:$0xff]  }
  0x26   : > { %1644 = vmatprep.subr.bf16.mxu1 %v3819_v40  ;;  %v3907_v34 = vld [vmem:[%s5428_s3 + $0x1e8] ss:$16 sps:$4 sm:$0xff]   ;;  %v402_v40 = vld [vmem:[%s4609_s27 + $0x20] sm:$0xff] }
  0x27   : > { %619 = vmatmul.mubr.bf16.vlgmr.msra.gmra.mrb[0].mxu0 %v3788_v29 }
  0x28   : > { %628 = vmatprep.mubr.bf16.mxu0 %v4238_v2  ;;  %1539 = vmatpush1.bf16.msra.mxu0 %v3814_v32  ;;  %v3909_v32 = vld [vmem:[%s5428_s3 + $0x1ec] ss:$16 sps:$4 sm:$0xff]  }
  0x29   : > { %1540 = vmatprep.subr.bf16.mxu0 %v3822_v33  ;;  %672 = vmatmul.mubr.bf16.vlgmr.msra.gmra.mrb[0].mxu1 %v3788_v29  ;;  %v3898_v29 = vld [vmem:[%s5428_s3 + $0x1c0] ss:$16 sps:$4 sm:$0xff]  }
  0x2a   : > { %681 = vmatprep.mubr.bf16.mxu1 %v4238_v2  ;;  %1645 = vmatpush1.bf16.msra.mxu1 %v3817_v43  ;;  %v3870_v2 = vld [vmem:[%s5428_s3 + $0x124] ss:$16 sps:$4 sm:$0xff]   ;;  %v3904_v33 = vld [vmem:[%s5428_s3 + $0x1e0] ss:$16 sps:$4 sm:$0xff]   ;;  %v403_v43 = vld [vmem:[%s4609_s27 + $0x28] sm:$0xff] }
  0x2b   : > { %1646 = vmatprep.subr.bf16.mxu1 %v3825_v44 }
  0x2c   : > { %1541 = vmatpush1.bf16.msra.mxu0 %v3820_v36  ;;  %v3915_v36 = vld [vmem:[%s5428_s3 + $0x20c] ss:$16 sps:$4 sm:$0xff]  }
  0x2d   : > { %1542 = vmatprep.subr.bf16.mxu0 %v3828_v37  ;;  %v398_v37 = vld [vmem:[%s4609_s27] sm:$0xff] }
  0x2e   : > { %1647 = vmatpush1.bf16.msra.mxu1 %v3823_v47 }
  0x2f   : > { %629 = vmatmul.mubr.bf16.gmra.mrb[4].mxu0 %v3807_v38  ;;  %1648 = vmatprep.subr.bf16.mxu1 %v3831_v48 }
  0x30   : > { %1543 = vmatpush1.bf16.msra.mxu0 %v3826_v41 }
  0x31   : > { %1544 = vmatprep.subr.bf16.mxu0 %v3834_v42  ;;  %682 = vmatmul.mubr.bf16.gmra.mrb[4].mxu1 %v3807_v38  ;;  %v399_v38 = vld [vmem:[%s4609_s27 + $0x8] sm:$0xff] }
  0x32   : > { %1649 = vmatpush1.bf16.msra.mxu1 %v3829_v51 }
  0x33   : > { %1650 = vmatprep.subr.bf16.mxu1 %v3837_v52 }
  0x34   : > { %1545 = vmatpush1.bf16.msra.mxu0 %v3832_v45 }
  0x35   : > { %1546 = vmatprep.subr.bf16.mxu0 %v3840_v46 }
  0x36   : > { %1651 = vmatpush1.bf16.msra.mxu1 %v3835_v55 }
  0x37   : > { %1652 = vmatprep.subr.bf16.mxu1 %v3843_v56  ;;  %v407_v56 = vld [vmem:[%s4609_s27 + $0x48] sm:$0xff] }
  0x38   : > { %1547 = vmatpush1.bf16.msra.mxu0 %v3838_v49 }
  0x39   : > { %1548 = vmatprep.subr.bf16.mxu0 %v3846_v50 }
  0x3a   : > { %1653 = vmatpush1.bf16.msra.mxu1 %v3841_v59 }
  0x3b   : > { %1654 = vmatprep.subr.bf16.mxu1 %v3849_v60 }
  0x3c   : > { %1549 = vmatpush1.bf16.msra.mxu0 %v3844_v53  ;;  %v406_v53 = vld [vmem:[%s4609_s27 + $0x40] sm:$0xff] }
  0x3d   : > { %1550 = vmatprep.subr.bf16.mxu0 %v3852_v54 }
  0x3e   : > { %1655 = vmatpush1.bf16.msra.mxu1 %v3847_v63  ;;  %v3910_v63 = vld [vmem:[%s5428_s3 + $0x200] ss:$16 sps:$4 sm:$0xff]  }
  0x3f   : > { %1656 = vmatprep.subr.bf16.mxu1 %v3855_v0  ;;  %v3913_v0 = vld [vmem:[%s5428_s3 + $0x208] ss:$16 sps:$4 sm:$0xff]  }
  0x40   : > { %1551 = vmatpush1.bf16.msra.mxu0 %v3850_v57 }
  0x41   : > { %1552 = vmatprep.subr.bf16.mxu0 %v3858_v58 }
  0x42   : > { %1657 = vmatpush1.bf16.msra.mxu1 %v3853_v3  ;;  %v411_v3 = vld [vmem:[%s4609_s27 + $0x68] sm:$0xff] }
  0x43   : > { %1658 = vmatprep.subr.bf16.mxu1 %v3861_v4  ;;  %v3918_v4 = vld [vmem:[%s5428_s3 + $0x224] ss:$16 sps:$4 sm:$0xff]  }
  0x44   : > { %1553 = vmatpush1.bf16.msra.mxu0 %v3856_v61  ;;  %v410_v61 = vld [vmem:[%s4609_s27 + $0x60] sm:$0xff] }
  0x45   : > { %1554 = vmatprep.subr.bf16.mxu0 %v3864_v62 }
  0x46   : > { %1659 = vmatpush1.bf16.msra.mxu1 %v3859_v7 }
  0x47   : > { %1660 = vmatprep.subr.bf16.mxu1 %v3867_v8  ;;  %v400_v8 = vld [vmem:[%s4609_s27 + $0x10] sm:$0xff] }
  0x48   : > { %1555 = vmatpush1.bf16.msra.mxu0 %v3862_v1 }
  0x49   : > { %1556 = vmatprep.subr.bf16.mxu0 %v3870_v2 }
  0x4a   : > { %1661 = vmatpush1.bf16.msra.mxu1 %v3865_v11 }
  0x4b   : > { %1662 = vmatprep.subr.bf16.mxu1 %v3873_v12 }
  0x4c   : > { %1557 = vmatpush1.bf16.msra.mxu0 %v3868_v5  ;;  %v3921_v5 = vld [vmem:[%s5428_s3 + $0x22c] ss:$16 sps:$4 sm:$0xff]  }
  0x4d   : > { %1558 = vmatprep.subr.bf16.mxu0 %v3876_v6 }
  0x4e   : > { %1663 = vmatpush1.bf16.msra.mxu1 %v3871_v15  ;;  %v3924_v15 = vld [vmem:[%s5428_s3 + $0x244] ss:$16 sps:$4 sm:$0xff]  }
  0x4f   : > { %1664 = vmatprep.subr.bf16.mxu1 %v3879_v16 }
  0x50   : > { %1559 = vmatpush1.bf16.msra.mxu0 %v3874_v9  ;;  %v3916_v9 = vld [vmem:[%s5428_s3 + $0x220] ss:$16 sps:$4 sm:$0xff]  }
  0x51   : > { %1560 = vmatprep.subr.bf16.mxu0 %v3882_v10  ;;  %v3919_v10 = vld [vmem:[%s5428_s3 + $0x228] ss:$16 sps:$4 sm:$0xff]  }
  0x52   : > { %1665 = vmatpush1.bf16.msra.mxu1 %v3877_v19  ;;  %v404_v19 = vld [vmem:[%s4609_s27 + $0x30] sm:$0xff] }
  0x53   : > { %1666 = vmatprep.subr.bf16.mxu1 %v3885_v20 }
  0x54   : > { %1561 = vmatpush1.bf16.msra.mxu0 %v3880_v13 }
  0x55   : > { %1562 = vmatprep.subr.bf16.mxu0 %v3888_v14  ;;  %v401_v14 = vld [vmem:[%s4609_s27 + $0x18] sm:$0xff] }
  0x56   : > { %1667 = vmatpush1.bf16.msra.mxu1 %v3883_v22 }
  0x57   : > { %1668 = vmatprep.subr.bf16.mxu1 %v3891_v23  ;;  %v405_v23 = vld [vmem:[%s4609_s27 + $0x38] sm:$0xff] }
  0x58   : > { %1563 = vmatpush1.bf16.msra.mxu0 %v3886_v17 }
  0x59   : > { %1564 = vmatprep.subr.bf16.mxu0 %v3894_v18 }
  0x5a   : > { %1669 = vmatpush1.bf16.msra.mxu1 %v3889_v24 }
  0x5b   : > { %1670 = vmatprep.subr.bf16.mxu1 %v3897_v25  ;;  %v3927_v25 = vld [vmem:[%s5428_s3 + $0x24c] ss:$16 sps:$4 sm:$0xff]  }
  0x5c   : > { %1565 = vmatpush1.bf16.msra.mxu0 %v3892_v21 }
  0x5d   : > { %1566 = vmatprep.subr.bf16.mxu0 %v3900_v27 }
  0x5e   : > { %1671 = vmatpush1.bf16.msra.mxu1 %v3895_v26 }
  0x5f   : > { %1672 = vmatprep.subr.bf16.mxu1 %v3903_v28 }
  0x60   : > { %1567 = vmatpush1.bf16.msra.mxu0 %v3898_v29 }
  0x61   : > { %1568 = vmatprep.subr.bf16.mxu0 %v3906_v31 }
  0x62   : > { %1673 = vmatpush1.bf16.msra.mxu1 %v3901_v30  ;;  %v3922_v30 = vld [vmem:[%s5428_s3 + $0x240] ss:$16 sps:$4 sm:$0xff]  }
  0x63   : > { %1674 = vmatprep.subr.bf16.mxu1 %v3909_v32 }
  0x64   : > { %1569 = vmatpush1.bf16.msra.mxu0 %v3904_v33 }
  0x65   : > { %1591 = vmatprep.subr.bf16.mxu0 %v3912_v35  ;;  %v3925_v35 = vld [vmem:[%s5428_s3 + $0x248] ss:$16 sps:$4 sm:$0xff]  }
  0x66   : > { %1675 = vmatpush1.bf16.msra.mxu1 %v3907_v34 }
  0x67   : > { %1697 = vmatprep.subr.bf16.mxu1 %v3915_v36 }
  0xfa   : > { %v620_v39 = vpop.f32.mrb[0].mxu0 }
  0xfb   : > { %v621_v41 = vadd.f32 %v620_v39, %v398_v37  ;;  %v622_v42 = vpop.f32.mrb[1].mxu0  ;;  %v3930_v39 = vld [vmem:[%s5428_s3 + $0x264] ss:$16 sps:$4 sm:$0xff]  }
  0xfc   : > { %v623_v44 = vadd.f32 %v622_v42, %v399_v38  ;;  %v624_v45 = vpop.f32.mrb[2].mxu0  ;;  %v673_v18 = vpop.f32.mrb[0].mxu1 }
  0xfd   : > { %v708_v46 = vmul.f32 0.2, %v621_v41  ;;  %v625_v47 = vadd.f32 %v624_v45, %v402_v40  ;;  %v626_v48 = vpop.f32.mrb[3].mxu0  ;;  %vm692_vm0 = vcmp.gt.f32.partialorder %v621_v41, 0.0  ;;  %v674_v21 = vadd.f32 %v673_v18, %v400_v8  ;;  %v675_v22 = vpop.f32.mrb[1].mxu1 }
  0xfe   : > { %v709_v49 = vmul.f32 0.2, %v623_v44  ;;  %v627_v50 = vadd.f32 %v626_v48, %v403_v43  ;;  %vm693_vm1 = vcmp.gt.f32.partialorder %v623_v44, 0.0  ;;  %v676_v27 = vadd.f32 %v675_v22, %v401_v14  ;;  %v677_v28 = vpop.f32.mrb[2].mxu1  ;;  %v3933_v43 = vld [vmem:[%s5428_s3 + $0x26c] ss:$16 sps:$4 sm:$0xff]  }
  0xff   : > { %vm696_vm2 = vcmp.gt.f32.partialorder %v625_v47, 0.0  ;;  %v712_v51 = vmul.f32 0.2, %v625_v47  ;;  %v724_v54 = vsel %vm692_vm0, %v621_v41, %v708_v46  ;;  %vm694_vm8 = vcmp.gt.f32.partialorder %v674_v21, 0.0  ;;  %v679_v33 = vpop.f32.mrb[3].mxu1 }
 0x100   : > { %vm697_vm3 = vcmp.gt.f32.partialorder %v627_v50, 0.0  ;;  %v713_v52 = vmul.f32 0.2, %v627_v50  ;;  %v725_v58 = vsel %vm693_vm1, %v623_v44, %v709_v49  ;;  %v710_v31 = vmul.f32 0.2, %v674_v21  ;;  %v409_v49 = vld [vmem:[%s4609_s27 + $0x58] sm:$0xff] }
 0x101   : > { %v728_v55 = vsel %vm696_vm2, %v625_v47, %v712_v51  ;;  %v678_v32 = vadd.f32 %v677_v28, %v404_v19  ;;  %vm695_vm9 = vcmp.gt.f32.partialorder %v676_v27, 0.0  ;;  %v711_v36 = vmul.f32 0.2, %v676_v27  ;;  %v408_v47 = vld [vmem:[%s4609_s27 + $0x50] sm:$0xff]  ;;  %v3949_v22 = vld [vmem:[%s5428_s3 + $0x2c8] ss:$16 sps:$4 sm:$0xff]  }
 0x102   : > { %v740_v57 = vpack.c.bf16 %v728_v55, %v724_v54  ;;  %v729_v59 = vsel %vm697_vm3, %v627_v50, %v713_v52  ;;  %v630_v60 = vpop.f32.mrb[4].mxu0  ;;  %v680_v38 = vadd.f32 %v679_v33, %v405_v23  ;;  %v726_v40 = vsel %vm694_vm8, %v674_v21, %v710_v31  ;;  %v3928_v54 = vld [vmem:[%s5428_s3 + $0x260] ss:$16 sps:$4 sm:$0xff]   ;;  %v3931_v55 = vld [vmem:[%s5428_s3 + $0x268] ss:$16 sps:$4 sm:$0xff]  }
 0x103   : > { %v741_v62 = vpack.c.bf16 %v729_v59, %v725_v58  ;;  %v631_v1 = vadd.f32 %v630_v60, %v406_v53  ;;  %v632_v2 = vpop.f32.mrb[5].mxu0  ;;  %vm698_vm10 = vcmp.gt.f32.partialorder %v678_v32, 0.0  ;;  %v714_v41 = vmul.f32 0.2, %v678_v32  ;;  %v412_v53 = vld [vmem:[%s4609_s27 + $0x70] sm:$0xff]  ;;  %v413_v59 = vld [vmem:[%s4609_s27 + $0x78] sm:$0xff] }
 0x104   : > { %v633_v6 = vadd.f32 %v632_v2, %v407_v56  ;;  %v634_v7 = vpop.f32.mrb[6].mxu0  ;;  %vm699_vm11 = vcmp.gt.f32.partialorder %v680_v38, 0.0  ;;  %v715_v44 = vmul.f32 0.2, %v680_v38  ;;  %v727_v46 = vsel %vm695_vm9, %v676_v27, %v711_v36  ;;  %v683_v52 = vpop.f32.mrb[4].mxu1 }
 0x105   : > { %1570 = vmatprep.mubr.bf16.mxu0 %v741_v62  ;;  %1676 = vmatprep.mubr.bf16.mxu1 %v741_v62  ;;  %vm700_vm4 = vcmp.gt.f32.partialorder %v631_v1, 0.0  ;;  %v716_v11 = vmul.f32 0.2, %v631_v1  ;;  %v635_v12 = vadd.f32 %v634_v7, %v410_v61  ;;  %v636_v13 = vpop.f32.mrb[7].mxu0  ;;  %v730_v48 = vsel %vm698_vm10, %v678_v32, %v714_v41  ;;  %v685_v58 = vpop.f32.mrb[5].mxu1 }
 0x106   : > { %1571 = vmatmul.mubr.bf16.vlgmr.msra.gmra.mrb[8].mxu0 %v740_v57  ;;  %1677 = vmatmul.mubr.bf16.vlgmr.msra.gmra.mrb[8].mxu1 %v740_v57  ;;  %vm701_vm5 = vcmp.gt.f32.partialorder %v633_v6, 0.0  ;;  %v717_v16 = vmul.f32 0.2, %v633_v6  ;;  %v637_v17 = vadd.f32 %v636_v13, %v411_v3  ;;  %v4665_v50 = vpack.c.bf16 %v730_v48, %v726_v40  ;;  %v3936_v60 = vld [vmem:[%s5428_s3 + $0x284] ss:$16 sps:$4 sm:$0xff]  }
 0x107   : > { %1592 = vmatpush1.bf16.msra.mxu0 %v3910_v63  ;;  %1698 = vmatpush1.bf16.msra.mxu1 %v3913_v0  ;;  %vm704_vm6 = vcmp.gt.f32.partialorder %v635_v12, 0.0  ;;  %v720_v20 = vmul.f32 0.2, %v635_v12  ;;  %v732_v24 = vsel %vm700_vm4, %v631_v1, %v716_v11  ;;  %v731_v51 = vsel %vm699_vm11, %v680_v38, %v715_v44  ;;  %v3939_v61 = vld [vmem:[%s5428_s3 + $0x28c] ss:$16 sps:$4 sm:$0xff]   ;;  %v687_v63 = vpop.f32.mrb[6].mxu1 }
 0x108   : > { %1593 = vmatprep.subr.bf16.mxu0 %v3918_v4  ;;  %1699 = vmatprep.subr.bf16.mxu1 %v3921_v5  ;;  %vm705_vm7 = vcmp.gt.f32.partialorder %v637_v17, 0.0  ;;  %v721_v26 = vmul.f32 0.2, %v637_v17  ;;  %v733_v29 = vsel %vm701_vm5, %v633_v6, %v717_v16  ;;  %v743_v56 = vpack.c.bf16 %v731_v51, %v727_v46  ;;  %v3934_v0 = vld [vmem:[%s5428_s3 + $0x280] ss:$16 sps:$4 sm:$0xff]   ;;  %v689_v3 = vpop.f32.mrb[7].mxu1 }
 0x109   : > { %v736_v34 = vsel %vm704_vm6, %v635_v12, %v720_v20  ;;  %v684_v57 = vadd.f32 %v683_v52, %v408_v47  ;;  %v686_v62 = vadd.f32 %v685_v58, %v409_v49  ;;  %v688_v2 = vadd.f32 %v687_v63, %v412_v53  ;;  %v3937_v4 = vld [vmem:[%s5428_s3 + $0x288] ss:$16 sps:$4 sm:$0xff]   ;;  %v3942_v7 = vld [vmem:[%s5428_s3 + $0x2a4] ss:$16 sps:$4 sm:$0xff]   ;;  %v3940_v16 = vld [vmem:[%s5428_s3 + $0x2a0] ss:$16 sps:$4 sm:$0xff]  }
 0x10a   : > { %v737_v37 = vsel %vm705_vm7, %v637_v17, %v721_v26  ;;  %v744_v45 = vpack.c.bf16 %v736_v34, %v732_v24  ;;  %v690_v6 = vadd.f32 %v689_v3, %v413_v59  ;;  %v3943_v17 = vld [vmem:[%s5428_s3 + $0x2a8] ss:$16 sps:$4 sm:$0xff]   ;;  %v3948_v19 = vld [vmem:[%s5428_s3 + $0x2c4] ss:$16 sps:$4 sm:$0xff]   ;;  %v3951_v20 = vld [vmem:[%s5428_s3 + $0x2cc] ss:$16 sps:$4 sm:$0xff]  }
 0x10b   : > { %1594 = vmatpush1.bf16.msra.mxu0 %v3916_v9  ;;  %1700 = vmatpush1.bf16.msra.mxu1 %v3919_v10  ;;  %v745_v42 = vpack.c.bf16 %v737_v37, %v733_v29  ;;  %vm702_vm12 = vcmp.gt.f32.partialorder %v684_v57, 0.0  ;;  %v718_v1 = vmul.f32 0.2, %v684_v57  ;;  %vm703_vm13 = vcmp.gt.f32.partialorder %v686_v62, 0.0  ;;  %v3945_v10 = vld [vmem:[%s5428_s3 + $0x2ac] ss:$16 sps:$4 sm:$0xff]  }
 0x10c   : > { %1595 = vmatprep.subr.bf16.mxu0 %v3924_v15  ;;  %1701 = vmatprep.subr.bf16.mxu1 %v3927_v25  ;;  %v719_v5 = vmul.f32 0.2, %v686_v62  ;;  %vm706_vm14 = vcmp.gt.f32.partialorder %v688_v2, 0.0  ;;  %v722_v8 = vmul.f32 0.2, %v688_v2  ;;  %vm707_vm15 = vcmp.gt.f32.partialorder %v690_v6, 0.0 }
 0x10d   : > { %1580 = vmatprep.mubr.bf16.mxu0 %v745_v42  ;;  %1686 = vmatprep.mubr.bf16.mxu1 %v745_v42  ;;  %v734_v9 = vsel %vm702_vm12, %v684_v57, %v718_v1  ;;  %v723_v11 = vmul.f32 0.2, %v690_v6  ;;  %v3946_v21 = vld [vmem:[%s5428_s3 + $0x2c0] ss:$16 sps:$4 sm:$0xff]   ;;  %v3954_v23 = vld [vmem:[%s5428_s3 + $0x2e4] ss:$16 sps:$4 sm:$0xff]  }
 0x10e   : > { %1581 = vmatmul.mubr.bf16.gmra.mrb[12].mxu0 %v744_v45  ;;  %1687 = vmatmul.mubr.bf16.gmra.mrb[12].mxu1 %v744_v45  ;;  %v735_v12 = vsel %vm703_vm13, %v686_v62, %v719_v5  ;;  %v738_v13 = vsel %vm706_vm14, %v688_v2, %v722_v8  ;;  %v3957_v24 = vld [vmem:[%s5428_s3 + $0x2ec] ss:$16 sps:$4 sm:$0xff]   ;;  %v3952_v25 = vld [vmem:[%s5428_s3 + $0x2e0] ss:$16 sps:$4 sm:$0xff]   ;;  %v3955_v26 = vld [vmem:[%s5428_s3 + $0x2e8] ss:$16 sps:$4 sm:$0xff]  }
 0x10f   : > { %1596 = vmatpush1.bf16.msra.mxu0 %v3922_v30  ;;  %1702 = vmatpush1.bf16.msra.mxu1 %v3925_v35  ;;  %v739_v14 = vsel %vm707_vm15, %v690_v6, %v723_v11  ;;  %v4693_v15 = vpack.c.bf16 %v738_v13, %v734_v9  ;;  %v3960_v27 = vld [vmem:[%s5428_s3 + $0x304] ss:$16 sps:$4 sm:$0xff]   ;;  %v3963_v28 = vld [vmem:[%s5428_s3 + $0x30c] ss:$16 sps:$4 sm:$0xff]   ;;  %v3958_v29 = vld [vmem:[%s5428_s3 + $0x300] ss:$16 sps:$4 sm:$0xff]  }
 0x110   : > { %1597 = vmatprep.subr.bf16.mxu0 %v3930_v39  ;;  %1703 = vmatprep.subr.bf16.mxu1 %v3933_v43  ;;  %v4701_v18 = vpack.c.bf16 %v739_v14, %v735_v12  ;;  %v3961_v30 = vld [vmem:[%s5428_s3 + $0x308] ss:$16 sps:$4 sm:$0xff]   ;;  %v3966_v31 = vld [vmem:[%s5428_s3 + $0x324] ss:$16 sps:$4 sm:$0xff]   ;;  %v3969_v32 = vld [vmem:[%s5428_s3 + $0x32c] ss:$16 sps:$4 sm:$0xff]  }
 0x111   : > { %1623 = vmatprep.mubr.bf16.mxu0 %v743_v56  ;;  %1729 = vmatprep.mubr.bf16.mxu1 %v743_v56  ;;  %v3964_v33 = vld [vmem:[%s5428_s3 + $0x320] ss:$16 sps:$4 sm:$0xff]   ;;  %v3967_v34 = vld [vmem:[%s5428_s3 + $0x328] ss:$16 sps:$4 sm:$0xff]   ;;  %v3972_v35 = vld [vmem:[%s5428_s3 + $0x344] ss:$16 sps:$4 sm:$0xff]  }
 0x112   : > { %v3975_v36 = vld [vmem:[%s5428_s3 + $0x34c] ss:$16 sps:$4 sm:$0xff]   ;;  %v3970_v37 = vld [vmem:[%s5428_s3 + $0x340] ss:$16 sps:$4 sm:$0xff]   ;;  %v3973_v38 = vld [vmem:[%s5428_s3 + $0x348] ss:$16 sps:$4 sm:$0xff]  }
 0x113   : > { %1598 = vmatpush1.bf16.msra.mxu0 %v3928_v54  ;;  %1704 = vmatpush1.bf16.msra.mxu1 %v3931_v55  ;;  %v3978_v39 = vld [vmem:[%s5428_s3 + $0x364] ss:$16 sps:$4 sm:$0xff]   ;;  %v3981_v40 = vld [vmem:[%s5428_s3 + $0x36c] ss:$16 sps:$4 sm:$0xff]   ;;  %v3976_v41 = vld [vmem:[%s5428_s3 + $0x360] ss:$16 sps:$4 sm:$0xff]  }
 0x114   : > { %1599 = vmatprep.subr.bf16.mxu0 %v3936_v60  ;;  %1705 = vmatprep.subr.bf16.mxu1 %v3939_v61  ;;  %v3979_v42 = vld [vmem:[%s5428_s3 + $0x368] ss:$16 sps:$4 sm:$0xff]   ;;  %v3984_v43 = vld [vmem:[%s5428_s3 + $0x384] ss:$16 sps:$4 sm:$0xff]   ;;  %v3987_v44 = vld [vmem:[%s5428_s3 + $0x38c] ss:$16 sps:$4 sm:$0xff]  }
 0x115   : > { %v3982_v45 = vld [vmem:[%s5428_s3 + $0x380] ss:$16 sps:$4 sm:$0xff]   ;;  %v3985_v46 = vld [vmem:[%s5428_s3 + $0x388] ss:$16 sps:$4 sm:$0xff]   ;;  %v3990_v47 = vld [vmem:[%s5428_s3 + $0x3a4] ss:$16 sps:$4 sm:$0xff]  }
 0x116   : > { %v3993_v48 = vld [vmem:[%s5428_s3 + $0x3ac] ss:$16 sps:$4 sm:$0xff]   ;;  %v3988_v49 = vld [vmem:[%s5428_s3 + $0x3a0] ss:$16 sps:$4 sm:$0xff]   ;;  %v3991_v51 = vld [vmem:[%s5428_s3 + $0x3a8] ss:$16 sps:$4 sm:$0xff]  }
 0x117   : > { %1600 = vmatpush1.bf16.msra.mxu0 %v3934_v0  ;;  %1706 = vmatpush1.bf16.msra.mxu1 %v3937_v4  ;;  %v3996_v52 = vld [vmem:[%s5428_s3 + $0x3c4] ss:$16 sps:$4 sm:$0xff]   ;;  %v3999_v53 = vld [vmem:[%s5428_s3 + $0x3cc] ss:$16 sps:$4 sm:$0xff]   ;;  %v3994_v54 = vld [vmem:[%s5428_s3 + $0x3c0] ss:$16 sps:$4 sm:$0xff]  }
 0x118   : > { %1601 = vmatprep.subr.bf16.mxu0 %v3942_v7  ;;  %1707 = vmatprep.subr.bf16.mxu1 %v3945_v10  ;;  %v3997_v55 = vld [vmem:[%s5428_s3 + $0x3c8] ss:$16 sps:$4 sm:$0xff]   ;;  %v4002_v56 = vld [vmem:[%s5428_s3 + $0x3e4] ss:$16 sps:$4 sm:$0xff]   ;;  %v4005_v57 = vld [vmem:[%s5428_s3 + $0x3ec] ss:$16 sps:$4 sm:$0xff]  }
 0x119   : > { %v4000_v58 = vld [vmem:[%s5428_s3 + $0x3e0] ss:$16 sps:$4 sm:$0xff]   ;;  %v4003_v59 = vld [vmem:[%s5428_s3 + $0x3e8] ss:$16 sps:$4 sm:$0xff]   ;;  %v4008_v60 = vld [vmem:[%s5430_s5 + $0x4] ss:$16 sps:$4 sm:$0xff]  }
 0x11a   : > { %v4011_v61 = vld [vmem:[%s5430_s5 + $0xc] ss:$16 sps:$4 sm:$0xff]   ;;  %v4006_v62 = vld [vmem:[%s5430_s5] ss:$16 sps:$4 sm:$0xff]   ;;  %v4009_v63 = vld [vmem:[%s5430_s5 + $0x8] ss:$16 sps:$4 sm:$0xff]  }
 0x11b   : > { %1602 = vmatpush1.bf16.msra.mxu0 %v3940_v16  ;;  %1708 = vmatpush1.bf16.msra.mxu1 %v3943_v17  ;;  %v4014_v0 = vld [vmem:[%s5430_s5 + $0x24] ss:$16 sps:$4 sm:$0xff]   ;;  %v4017_v1 = vld [vmem:[%s5430_s5 + $0x2c] ss:$16 sps:$4 sm:$0xff]   ;;  %v4012_v2 = vld [vmem:[%s5430_s5 + $0x20] ss:$16 sps:$4 sm:$0xff]  }
 0x11c   : > { %1603 = vmatprep.subr.bf16.mxu0 %v3948_v19  ;;  %1709 = vmatprep.subr.bf16.mxu1 %v3951_v20  ;;  %v4015_v3 = vld [vmem:[%s5430_s5 + $0x28] ss:$16 sps:$4 sm:$0xff]   ;;  %v4023_v4 = vld [vmem:[%s5430_s5 + $0x4c] ss:$16 sps:$4 sm:$0xff]   ;;  %v4018_v5 = vld [vmem:[%s5430_s5 + $0x40] ss:$16 sps:$4 sm:$0xff]  }
 0x11d   : > { %v4021_v6 = vld [vmem:[%s5430_s5 + $0x48] ss:$16 sps:$4 sm:$0xff]   ;;  %v4026_v7 = vld [vmem:[%s5430_s5 + $0x64] ss:$16 sps:$4 sm:$0xff]   ;;  %v4029_v8 = vld [vmem:[%s5430_s5 + $0x6c] ss:$16 sps:$4 sm:$0xff]  }
 0x11e   : > { %v4024_v9 = vld [vmem:[%s5430_s5 + $0x60] ss:$16 sps:$4 sm:$0xff]   ;;  %v4027_v10 = vld [vmem:[%s5430_s5 + $0x68] ss:$16 sps:$4 sm:$0xff]   ;;  %v4032_v11 = vld [vmem:[%s5430_s5 + $0x84] ss:$16 sps:$4 sm:$0xff]  }
 0x11f   : > { %1604 = vmatpush1.bf16.msra.mxu0 %v3946_v21  ;;  %1710 = vmatpush1.bf16.msra.mxu1 %v3949_v22  ;;  %v4035_v12 = vld [vmem:[%s5430_s5 + $0x8c] ss:$16 sps:$4 sm:$0xff]   ;;  %v4030_v13 = vld [vmem:[%s5430_s5 + $0x80] ss:$16 sps:$4 sm:$0xff]   ;;  %v4033_v14 = vld [vmem:[%s5430_s5 + $0x88] ss:$16 sps:$4 sm:$0xff]  }
 0x120   : > { %1605 = vmatprep.subr.bf16.mxu0 %v3954_v23  ;;  %1711 = vmatprep.subr.bf16.mxu1 %v3957_v24  ;;  %v4041_v16 = vld [vmem:[%s5430_s5 + $0xac] ss:$16 sps:$4 sm:$0xff]   ;;  %v4036_v17 = vld [vmem:[%s5430_s5 + $0xa0] ss:$16 sps:$4 sm:$0xff]   ;;  %v4044_v19 = vld [vmem:[%s5430_s5 + $0xc4] ss:$16 sps:$4 sm:$0xff]  }
 0x121   : > { %v4047_v20 = vld [vmem:[%s5430_s5 + $0xcc] ss:$16 sps:$4 sm:$0xff]   ;;  %v4042_v21 = vld [vmem:[%s5430_s5 + $0xc0] ss:$16 sps:$4 sm:$0xff]   ;;  %v4045_v22 = vld [vmem:[%s5430_s5 + $0xc8] ss:$16 sps:$4 sm:$0xff]  }
 0x122   : > { %v4050_v23 = vld [vmem:[%s5430_s5 + $0xe4] ss:$16 sps:$4 sm:$0xff]   ;;  %v4053_v24 = vld [vmem:[%s5430_s5 + $0xec] ss:$16 sps:$4 sm:$0xff]  }
 0x123   : > { %1606 = vmatpush1.bf16.msra.mxu0 %v3952_v25  ;;  %1712 = vmatpush1.bf16.msra.mxu1 %v3955_v26  ;;  %v4048_v25 = vld [vmem:[%s5430_s5 + $0xe0] ss:$16 sps:$4 sm:$0xff]   ;;  %v4051_v26 = vld [vmem:[%s5430_s5 + $0xe8] ss:$16 sps:$4 sm:$0xff]  }
 0x124   : > { %1607 = vmatprep.subr.bf16.mxu0 %v3960_v27  ;;  %1713 = vmatprep.subr.bf16.mxu1 %v3963_v28  ;;  %v4056_v27 = vld [vmem:[%s5430_s5 + $0x104] ss:$16 sps:$4 sm:$0xff]   ;;  %v4059_v28 = vld [vmem:[%s5430_s5 + $0x10c] ss:$16 sps:$4 sm:$0xff]  }
 0x127   : > { %1608 = vmatpush1.bf16.msra.mxu0 %v3958_v29  ;;  %1714 = vmatpush1.bf16.msra.mxu1 %v3961_v30  ;;  %v4054_v29 = vld [vmem:[%s5430_s5 + $0x100] ss:$16 sps:$4 sm:$0xff]   ;;  %v4057_v30 = vld [vmem:[%s5430_s5 + $0x108] ss:$16 sps:$4 sm:$0xff]  }
 0x128   : > { %1609 = vmatprep.subr.bf16.mxu0 %v3966_v31  ;;  %1715 = vmatprep.subr.bf16.mxu1 %v3969_v32  ;;  %v4062_v31 = vld [vmem:[%s5430_s5 + $0x124] ss:$16 sps:$4 sm:$0xff]   ;;  %v4065_v32 = vld [vmem:[%s5430_s5 + $0x12c] ss:$16 sps:$4 sm:$0xff]  }
 0x12b   : > { %1610 = vmatpush1.bf16.msra.mxu0 %v3964_v33  ;;  %1716 = vmatpush1.bf16.msra.mxu1 %v3967_v34  ;;  %v4060_v33 = vld [vmem:[%s5430_s5 + $0x120] ss:$16 sps:$4 sm:$0xff]   ;;  %v4063_v34 = vld [vmem:[%s5430_s5 + $0x128] ss:$16 sps:$4 sm:$0xff]  }
 0x12c   : > { %1611 = vmatprep.subr.bf16.mxu0 %v3972_v35  ;;  %1717 = vmatprep.subr.bf16.mxu1 %v3975_v36  ;;  %v4068_v35 = vld [vmem:[%s5430_s5 + $0x144] ss:$16 sps:$4 sm:$0xff]   ;;  %v4071_v36 = vld [vmem:[%s5430_s5 + $0x14c] ss:$16 sps:$4 sm:$0xff]  }
 0x12f   : > { %1612 = vmatpush1.bf16.msra.mxu0 %v3970_v37  ;;  %1718 = vmatpush1.bf16.msra.mxu1 %v3973_v38  ;;  %v4066_v37 = vld [vmem:[%s5430_s5 + $0x140] ss:$16 sps:$4 sm:$0xff]   ;;  %v4069_v38 = vld [vmem:[%s5430_s5 + $0x148] ss:$16 sps:$4 sm:$0xff]  }
 0x130   : > { %1613 = vmatprep.subr.bf16.mxu0 %v3978_v39  ;;  %1719 = vmatprep.subr.bf16.mxu1 %v3981_v40  ;;  %v4074_v39 = vld [vmem:[%s5430_s5 + $0x164] ss:$16 sps:$4 sm:$0xff]   ;;  %v4077_v40 = vld [vmem:[%s5430_s5 + $0x16c] ss:$16 sps:$4 sm:$0xff]  }
 0x133   : > { %1614 = vmatpush1.bf16.msra.mxu0 %v3976_v41  ;;  %1720 = vmatpush1.bf16.msra.mxu1 %v3979_v42  ;;  %v4072_v41 = vld [vmem:[%s5430_s5 + $0x160] ss:$16 sps:$4 sm:$0xff]   ;;  %v4075_v42 = vld [vmem:[%s5430_s5 + $0x168] ss:$16 sps:$4 sm:$0xff]  }
 0x134   : > { %1615 = vmatprep.subr.bf16.mxu0 %v3984_v43  ;;  %1721 = vmatprep.subr.bf16.mxu1 %v3987_v44  ;;  %v4080_v43 = vld [vmem:[%s5430_s5 + $0x184] ss:$16 sps:$4 sm:$0xff]   ;;  %v4083_v44 = vld [vmem:[%s5430_s5 + $0x18c] ss:$16 sps:$4 sm:$0xff]  }
 0x137   : > { %1616 = vmatpush1.bf16.msra.mxu0 %v3982_v45  ;;  %1722 = vmatpush1.bf16.msra.mxu1 %v3985_v46  ;;  %v4078_v45 = vld [vmem:[%s5430_s5 + $0x180] ss:$16 sps:$4 sm:$0xff]   ;;  %v4081_v46 = vld [vmem:[%s5430_s5 + $0x188] ss:$16 sps:$4 sm:$0xff]  }
 0x138   : > { %1617 = vmatprep.subr.bf16.mxu0 %v3990_v47  ;;  %1723 = vmatprep.subr.bf16.mxu1 %v3993_v48  ;;  %v4086_v47 = vld [vmem:[%s5430_s5 + $0x1a4] ss:$16 sps:$4 sm:$0xff]   ;;  %v4089_v48 = vld [vmem:[%s5430_s5 + $0x1ac] ss:$16 sps:$4 sm:$0xff]  }
 0x13b   : > { %1618 = vmatpush1.bf16.msra.mxu0 %v3988_v49  ;;  %1724 = vmatpush1.bf16.msra.mxu1 %v3991_v51  ;;  %v4084_v49 = vld [vmem:[%s5430_s5 + $0x1a0] ss:$16 sps:$4 sm:$0xff]   ;;  %v4087_v51 = vld [vmem:[%s5430_s5 + $0x1a8] ss:$16 sps:$4 sm:$0xff]  }
 0x13c   : > { %1619 = vmatprep.subr.bf16.mxu0 %v3996_v52  ;;  %1725 = vmatprep.subr.bf16.mxu1 %v3999_v53  ;;  %v4092_v52 = vld [vmem:[%s5430_s5 + $0x1c4] ss:$16 sps:$4 sm:$0xff]   ;;  %v4095_v53 = vld [vmem:[%s5430_s5 + $0x1cc] ss:$16 sps:$4 sm:$0xff]  }
 0x13f   : > { %1620 = vmatpush1.bf16.msra.mxu0 %v3994_v54  ;;  %1726 = vmatpush1.bf16.msra.mxu1 %v3997_v55  ;;  %v4090_v54 = vld [vmem:[%s5430_s5 + $0x1c0] ss:$16 sps:$4 sm:$0xff]   ;;  %v4093_v55 = vld [vmem:[%s5430_s5 + $0x1c8] ss:$16 sps:$4 sm:$0xff]  }
 0x140   : > { %1621 = vmatprep.subr.bf16.mxu0 %v4002_v56  ;;  %1727 = vmatprep.subr.bf16.mxu1 %v4005_v57  ;;  %v4098_v56 = vld [vmem:[%s5430_s5 + $0x1e4] ss:$16 sps:$4 sm:$0xff]   ;;  %v4101_v57 = vld [vmem:[%s5430_s5 + $0x1ec] ss:$16 sps:$4 sm:$0xff]  }
 0x143   : > { %1622 = vmatpush1.bf16.msra.mxu0 %v4000_v58  ;;  %1728 = vmatpush1.bf16.msra.mxu1 %v4003_v59  ;;  %v4096_v58 = vld [vmem:[%s5430_s5 + $0x1e0] ss:$16 sps:$4 sm:$0xff]   ;;  %v4099_v59 = vld [vmem:[%s5430_s5 + $0x1e8] ss:$16 sps:$4 sm:$0xff]  }
 0x144   : > { %2596 = vmatprep.subr.bf16.mxu0 %v4008_v60  ;;  %2702 = vmatprep.subr.bf16.mxu1 %v4011_v61  ;;  %v4104_v60 = vld [vmem:[%s5430_s5 + $0x204] ss:$16 sps:$4 sm:$0xff]   ;;  %v4107_v61 = vld [vmem:[%s5430_s5 + $0x20c] ss:$16 sps:$4 sm:$0xff]  }
 0x146   : > { %1624 = vmatmul.mubr.bf16.vlgmr.msra.gmra.mrb[8].mxu0 %v4665_v50  ;;  %1730 = vmatmul.mubr.bf16.vlgmr.msra.gmra.mrb[8].mxu1 %v4665_v50  ;;  %v4020_v50 = vld [vmem:[%s5430_s5 + $0x44] ss:$16 sps:$4 sm:$0xff]  }
 0x147   : > { %1633 = vmatprep.mubr.bf16.mxu0 %v4701_v18  ;;  %1739 = vmatprep.mubr.bf16.mxu1 %v4701_v18  ;;  %v4039_v18 = vld [vmem:[%s5430_s5 + $0xa8] ss:$16 sps:$4 sm:$0xff]  }
 0x148   : > { %2597 = vmatpush1.bf16.msra.mxu0 %v4006_v62  ;;  %2703 = vmatpush1.bf16.msra.mxu1 %v4009_v63  ;;  %v878_v62 = vlaneseq }
 0x149   : > { %2598 = vmatprep.subr.bf16.mxu0 %v4014_v0  ;;  %2704 = vmatprep.subr.bf16.mxu1 %v4017_v1 }
 0x14a   : > { %v5027_v63 = vshrl.u32 %v878_v62, 7 }
 0x14c   : > { %2599 = vmatpush1.bf16.msra.mxu0 %v4012_v2  ;;  %2705 = vmatpush1.bf16.msra.mxu1 %v4015_v3  ;;  %v880_v0 = vsub.s32 0, %v5027_v63  ;;  %v888_v1 = vsub.s32 2, %v5027_v63  ;;  %v876_v2 = vld [vmem:[%s5429_s4] sm:$0xf]  ;;  %v884_v3 = vsub.s32 1, %v5027_v63 }
 0x14d   : > { %2600 = vmatprep.subr.bf16.mxu0 %v4020_v50  ;;  %2706 = vmatprep.subr.bf16.mxu1 %v4023_v4  ;;  %v892_v50 = vsub.s32 3, %v5027_v63 }
 0x14e   : > { %1634 = vmatmul.mubr.bf16.gmra.mrb[12].mxu0 %v4693_v15  ;;  %1740 = vmatmul.mubr.bf16.gmra.mrb[12].mxu1 %v4693_v15  ;;  %v4038_v15 = vld [vmem:[%s5430_s5 + $0xa4] ss:$16 sps:$4 sm:$0xff]   ;;  %v5038_v4 = vrot.slane %v876_v2, %v880_v0 }
 0x150   : > { %2601 = vmatpush1.bf16.msra.mxu0 %v4018_v5  ;;  %2707 = vmatpush1.bf16.msra.mxu1 %v4021_v6  ;;  %v5042_v5 = vrot.slane %v876_v2, %v888_v1  ;;  %v5046_v6 = vrot.slane %v876_v2, %v884_v3 }
 0x151   : > { %2602 = vmatprep.subr.bf16.mxu0 %v4026_v7  ;;  %2708 = vmatprep.subr.bf16.mxu1 %v4029_v8  ;;  %v5050_v7 = vrot.slane %v876_v2, %v892_v50  ;;  %v4105_v2 = vld [vmem:[%s5430_s5 + $0x208] ss:$16 sps:$4 sm:$0xff]  }
 0x154   : > { %2603 = vmatpush1.bf16.msra.mxu0 %v4024_v9  ;;  %2709 = vmatpush1.bf16.msra.mxu1 %v4027_v10 }
 0x155   : > { %2604 = vmatprep.subr.bf16.mxu0 %v4032_v11  ;;  %2710 = vmatprep.subr.bf16.mxu1 %v4035_v12 }
 0x158   : > { %2605 = vmatpush1.bf16.msra.mxu0 %v4030_v13  ;;  %2711 = vmatpush1.bf16.msra.mxu1 %v4033_v14 }
 0x159   : > { %2606 = vmatprep.subr.bf16.mxu0 %v4038_v15  ;;  %2712 = vmatprep.subr.bf16.mxu1 %v4041_v16 }
 0x15c   : > { %2607 = vmatpush1.bf16.msra.mxu0 %v4036_v17  ;;  %2713 = vmatpush1.bf16.msra.mxu1 %v4039_v18 }
 0x15d   : > { %2608 = vmatprep.subr.bf16.mxu0 %v4044_v19  ;;  %2714 = vmatprep.subr.bf16.mxu1 %v4047_v20 }
 0x160   : > { %2609 = vmatpush1.bf16.msra.mxu0 %v4042_v21  ;;  %2715 = vmatpush1.bf16.msra.mxu1 %v4045_v22 }
 0x161   : > { %2610 = vmatprep.subr.bf16.mxu0 %v4050_v23  ;;  %2716 = vmatprep.subr.bf16.mxu1 %v4053_v24 }
 0x164   : > { %2611 = vmatpush1.bf16.msra.mxu0 %v4048_v25  ;;  %2717 = vmatpush1.bf16.msra.mxu1 %v4051_v26 }
 0x165   : > { %2612 = vmatprep.subr.bf16.mxu0 %v4056_v27  ;;  %2718 = vmatprep.subr.bf16.mxu1 %v4059_v28 }
 0x168   : > { %2613 = vmatpush1.bf16.msra.mxu0 %v4054_v29  ;;  %2719 = vmatpush1.bf16.msra.mxu1 %v4057_v30 }
 0x169   : > { %2614 = vmatprep.subr.bf16.mxu0 %v4062_v31  ;;  %2720 = vmatprep.subr.bf16.mxu1 %v4065_v32 }
 0x16c   : > { %2615 = vmatpush1.bf16.msra.mxu0 %v4060_v33  ;;  %2721 = vmatpush1.bf16.msra.mxu1 %v4063_v34 }
 0x16d   : > { %2616 = vmatprep.subr.bf16.mxu0 %v4068_v35  ;;  %2722 = vmatprep.subr.bf16.mxu1 %v4071_v36 }
 0x170   : > { %2617 = vmatpush1.bf16.msra.mxu0 %v4066_v37  ;;  %2723 = vmatpush1.bf16.msra.mxu1 %v4069_v38 }
 0x171   : > { %2618 = vmatprep.subr.bf16.mxu0 %v4074_v39  ;;  %2724 = vmatprep.subr.bf16.mxu1 %v4077_v40 }
 0x174   : > { %2619 = vmatpush1.bf16.msra.mxu0 %v4072_v41  ;;  %2725 = vmatpush1.bf16.msra.mxu1 %v4075_v42 }
 0x175   : > { %2620 = vmatprep.subr.bf16.mxu0 %v4080_v43  ;;  %2726 = vmatprep.subr.bf16.mxu1 %v4083_v44 }
 0x178   : > { %2621 = vmatpush1.bf16.msra.mxu0 %v4078_v45  ;;  %2727 = vmatpush1.bf16.msra.mxu1 %v4081_v46 }
 0x179   : > { %2622 = vmatprep.subr.bf16.mxu0 %v4086_v47  ;;  %2728 = vmatprep.subr.bf16.mxu1 %v4089_v48 }
 0x17c   : > { %2623 = vmatpush1.bf16.msra.mxu0 %v4084_v49  ;;  %2729 = vmatpush1.bf16.msra.mxu1 %v4087_v51 }
 0x17d   : > { %2624 = vmatprep.subr.bf16.mxu0 %v4092_v52  ;;  %2730 = vmatprep.subr.bf16.mxu1 %v4095_v53  ;;  %v4102_v53 = vld [vmem:[%s5430_s5 + $0x200] ss:$16 sps:$4 sm:$0xff]  }
 0x180   : > { %2625 = vmatpush1.bf16.msra.mxu0 %v4090_v54  ;;  %2731 = vmatpush1.bf16.msra.mxu1 %v4093_v55 }
 0x181   : > { %2626 = vmatprep.subr.bf16.mxu0 %v4098_v56  ;;  %2732 = vmatprep.subr.bf16.mxu1 %v4101_v57 }
 0x184   : > { %2627 = vmatpush1.bf16.msra.mxu0 %v4096_v58  ;;  %2733 = vmatpush1.bf16.msra.mxu1 %v4099_v59 }
 0x185   : > { %2649 = vmatprep.subr.bf16.mxu0 %v4104_v60  ;;  %2755 = vmatprep.subr.bf16.mxu1 %v4107_v61 }
 0x219   : > { %v1625_v8 = vpop.f32.mrb[8].mxu0  ;;  %v1731_v9 = vpop.f32.mrb[8].mxu1 }
 0x21a   : > { %v3691_v10 = vadd.f32 %v1625_v8, %v5038_v4  ;;  %v3699_v11 = vadd.f32 %v1731_v9, %v5042_v5  ;;  %v1627_v12 = vpop.f32.mrb[9].mxu0  ;;  %v1733_v13 = vpop.f32.mrb[9].mxu1 }
 0x21b   : > { %v3692_v14 = vadd.f32 %v1627_v12, %v5046_v6  ;;  %v3700_v15 = vadd.f32 %v1733_v13, %v5050_v7  ;;  %v1629_v16 = vpop.f32.mrb[10].mxu0  ;;  %v1735_v17 = vpop.f32.mrb[10].mxu1 }
 0x21c   : > { %vm1750_vm0 = vcmp.gt.f32.partialorder %v3691_v10, 0.0  ;;  %v1766_v18 = vmul.f32 0.2, %v3691_v10  ;;  %vm1752_vm1 = vcmp.gt.f32.partialorder %v3699_v11, 0.0  ;;  %v1768_v19 = vmul.f32 0.2, %v3699_v11 }
 0x21d   : > { %vm1751_vm2 = vcmp.gt.f32.partialorder %v3692_v14, 0.0  ;;  %v1767_v20 = vmul.f32 0.2, %v3692_v14  ;;  %vm1753_vm3 = vcmp.gt.f32.partialorder %v3700_v15, 0.0  ;;  %v3693_v21 = vadd.f32 %v1629_v16, %v5038_v4  ;;  %v1631_v23 = vpop.f32.mrb[11].mxu0  ;;  %v1737_v24 = vpop.f32.mrb[11].mxu1 }
 0x21e   : > { %v3701_v22 = vadd.f32 %v1735_v17, %v5042_v5  ;;  %v1782_v25 = vsel %vm1750_vm0, %v3691_v10, %v1766_v18  ;;  %v1769_v26 = vmul.f32 0.2, %v3700_v15  ;;  %v3694_v27 = vadd.f32 %v1631_v23, %v5046_v6  ;;  %v4110_v10 = vld [vmem:[%s5430_s5 + $0x224] ss:$16 sps:$4 sm:$0xff]  }
 0x21f   : > { %v3702_v28 = vadd.f32 %v1737_v24, %v5050_v7  ;;  %vm1754_vm4 = vcmp.gt.f32.partialorder %v3693_v21, 0.0  ;;  %v1770_v29 = vmul.f32 0.2, %v3693_v21  ;;  %v1784_v31 = vsel %vm1752_vm1, %v3699_v11, %v1768_v19  ;;  %v4119_v24 = vld [vmem:[%s5430_s5 + $0x24c] ss:$16 sps:$4 sm:$0xff]  }
 0x220   : > { %vm1756_vm5 = vcmp.gt.f32.partialorder %v3701_v22, 0.0  ;;  %v1772_v30 = vmul.f32 0.2, %v3701_v22  ;;  %vm1755_vm6 = vcmp.gt.f32.partialorder %v3694_v27, 0.0  ;;  %v1771_v32 = vmul.f32 0.2, %v3694_v27 }
 0x221   : > { %v1773_v33 = vmul.f32 0.2, %v3702_v28  ;;  %v1786_v34 = vsel %vm1754_vm4, %v3693_v21, %v1770_v29  ;;  %vm1757_vm7 = vcmp.gt.f32.partialorder %v3702_v28, 0.0  ;;  %v1635_v36 = vpop.f32.mrb[12].mxu0  ;;  %v1741_v37 = vpop.f32.mrb[12].mxu1  ;;  %v1783_v38 = vsel %vm1751_vm2, %v3692_v14, %v1767_v20 }
 0x222   : > { %v1788_v35 = vsel %vm1756_vm5, %v3701_v22, %v1772_v30  ;;  %v1798_v39 = vpack.c.bf16 %v1786_v34, %v1782_v25  ;;  %v3695_v41 = vadd.f32 %v1635_v36, %v5038_v4  ;;  %v3703_v42 = vadd.f32 %v1741_v37, %v5042_v5  ;;  %v1637_v43 = vpop.f32.mrb[13].mxu0  ;;  %v1743_v44 = vpop.f32.mrb[13].mxu1  ;;  %v4108_v14 = vld [vmem:[%s5430_s5 + $0x220] ss:$16 sps:$4 sm:$0xff]   ;;  %v4116_v20 = vld [vmem:[%s5430_s5 + $0x244] ss:$16 sps:$4 sm:$0xff]  }
 0x223   : > { %v5062_v40 = vpack.c.bf16 %v1788_v35, %v1784_v31  ;;  %v3696_v45 = vadd.f32 %v1637_v43, %v5046_v6  ;;  %v3704_v46 = vadd.f32 %v1743_v44, %v5050_v7  ;;  %v1639_v47 = vpop.f32.mrb[14].mxu0  ;;  %v1745_v48 = vpop.f32.mrb[14].mxu1  ;;  %v1787_v49 = vsel %vm1755_vm6, %v3694_v27, %v1771_v32  ;;  %v4114_v29 = vld [vmem:[%s5430_s5 + $0x240] ss:$16 sps:$4 sm:$0xff]   ;;  %v4117_v30 = vld [vmem:[%s5430_s5 + $0x248] ss:$16 sps:$4 sm:$0xff]  }
 0x224   : > { %v1785_v51 = vsel %vm1753_vm3, %v3700_v15, %v1769_v26  ;;  %vm1758_vm8 = vcmp.gt.f32.partialorder %v3695_v41, 0.0  ;;  %v1774_v52 = vmul.f32 0.2, %v3695_v41  ;;  %vm1760_vm9 = vcmp.gt.f32.partialorder %v3703_v42, 0.0  ;;  %v1641_v60 = vpop.f32.mrb[15].mxu0  ;;  %v1747_v61 = vpop.f32.mrb[15].mxu1 }
 0x225   : > { %v1789_v54 = vsel %vm1757_vm7, %v3702_v28, %v1773_v33  ;;  %v1776_v55 = vmul.f32 0.2, %v3703_v42  ;;  %vm1759_vm10 = vcmp.gt.f32.partialorder %v3696_v45, 0.0  ;;  %v1775_v56 = vmul.f32 0.2, %v3696_v45 }
 0x226   : > { %vm1761_vm11 = vcmp.gt.f32.partialorder %v3704_v46, 0.0  ;;  %v1777_v57 = vmul.f32 0.2, %v3704_v46  ;;  %v3697_v58 = vadd.f32 %v1639_v47, %v5038_v4  ;;  %v3705_v59 = vadd.f32 %v1745_v48, %v5042_v5  ;;  %v4113_v4 = vld [vmem:[%s5430_s5 + $0x22c] ss:$16 sps:$4 sm:$0xff]  }
 0x227   : > { %v1799_v62 = vpack.c.bf16 %v1787_v49, %v1783_v38  ;;  %v3698_v8 = vadd.f32 %v1641_v60, %v5046_v6  ;;  %v3706_v9 = vadd.f32 %v1747_v61, %v5050_v7  ;;  %v1790_v5 = vsel %vm1758_vm8, %v3695_v41, %v1774_v52  ;;  %v4111_v15 = vld [vmem:[%s5430_s5 + $0x228] ss:$16 sps:$4 sm:$0xff]   ;;  %v4122_v31 = vld [vmem:[%s5430_s5 + $0x264] ss:$16 sps:$4 sm:$0xff]   ;;  %v4125_v32 = vld [vmem:[%s5430_s5 + $0x26c] ss:$16 sps:$4 sm:$0xff]  }
 0x228   : > { %v1801_v11 = vpack.c.bf16 %v1789_v54, %v1785_v51  ;;  %vm1762_vm12 = vcmp.gt.f32.partialorder %v3697_v58, 0.0  ;;  %v1778_v12 = vmul.f32 0.2, %v3697_v58  ;;  %vm1764_vm13 = vcmp.gt.f32.partialorder %v3705_v59, 0.0  ;;  %v4120_v33 = vld [vmem:[%s5430_s5 + $0x260] ss:$16 sps:$4 sm:$0xff]  }
 0x229   : > { %v1780_v13 = vmul.f32 0.2, %v3705_v59  ;;  %2628 = vmatprep.mubr.bf16.mxu0 %v1799_v62  ;;  %2734 = vmatprep.mubr.bf16.mxu1 %v1799_v62  ;;  %vm1763_vm14 = vcmp.gt.f32.partialorder %v3698_v8, 0.0  ;;  %v1779_v6 = vmul.f32 0.2, %v3698_v8  ;;  %vm1765_vm15 = vcmp.gt.f32.partialorder %v3706_v9, 0.0 }
 0x22a   : > { %v1781_v7 = vmul.f32 0.2, %v3706_v9  ;;  %2629 = vmatmul.mubr.bf16.vlgmr.msra.gmra.mrb[16].mxu0 %v1798_v39  ;;  %2735 = vmatmul.mubr.bf16.vlgmr.msra.gmra.mrb[16].mxu1 %v1798_v39  ;;  %v1791_v16 = vsel %vm1759_vm10, %v3696_v45, %v1775_v56  ;;  %v1794_v17 = vsel %vm1762_vm12, %v3697_v58, %v1778_v12  ;;  %v1793_v18 = vsel %vm1761_vm11, %v3704_v46, %v1777_v57  ;;  %v4123_v34 = vld [vmem:[%s5430_s5 + $0x268] ss:$16 sps:$4 sm:$0xff]   ;;  %v4128_v35 = vld [vmem:[%s5430_s5 + $0x284] ss:$16 sps:$4 sm:$0xff]  }
 0x22b   : > { %2650 = vmatpush1.bf16.msra.mxu0 %v4102_v53  ;;  %2756 = vmatpush1.bf16.msra.mxu1 %v4105_v2  ;;  %v1795_v19 = vsel %vm1763_vm14, %v3698_v8, %v1779_v6  ;;  %v1802_v21 = vpack.c.bf16 %v1794_v17, %v1790_v5  ;;  %v1792_v26 = vsel %vm1760_vm9, %v3703_v42, %v1776_v55  ;;  %v4131_v36 = vld [vmem:[%s5430_s5 + $0x28c] ss:$16 sps:$4 sm:$0xff]   ;;  %v4126_v37 = vld [vmem:[%s5430_s5 + $0x280] ss:$16 sps:$4 sm:$0xff]   ;;  %v4129_v38 = vld [vmem:[%s5430_s5 + $0x288] ss:$16 sps:$4 sm:$0xff]  }
 0x22c   : > { %2651 = vmatprep.subr.bf16.mxu0 %v4110_v10  ;;  %2757 = vmatprep.subr.bf16.mxu1 %v4113_v4  ;;  %v1797_v22 = vsel %vm1765_vm15, %v3706_v9, %v1781_v7  ;;  %v1803_v23 = vpack.c.bf16 %v1795_v19, %v1791_v16  ;;  %v1796_v27 = vsel %vm1764_vm13, %v3705_v59, %v1780_v13  ;;  %v4134_v39 = vld [vmem:[%s5430_s5 + $0x2a4] ss:$16 sps:$4 sm:$0xff]   ;;  %v4137_v41 = vld [vmem:[%s5430_s5 + $0x2ac] ss:$16 sps:$4 sm:$0xff]   ;;  %v4132_v42 = vld [vmem:[%s5430_s5 + $0x2a0] ss:$16 sps:$4 sm:$0xff]  }
 0x22d   : > { %v5104_v25 = vpack.c.bf16 %v1797_v22, %v1793_v18  ;;  %v5108_v28 = vpack.c.bf16 %v1796_v27, %v1792_v26  ;;  %v4135_v43 = vld [vmem:[%s5430_s5 + $0x2a8] ss:$16 sps:$4 sm:$0xff]   ;;  %v4140_v44 = vld [vmem:[%s5430_s5 + $0x2c4] ss:$16 sps:$4 sm:$0xff]   ;;  %v4143_v45 = vld [vmem:[%s5430_s5 + $0x2cc] ss:$16 sps:$4 sm:$0xff]  }
 0x22e   : > { %2638 = vmatprep.mubr.bf16.mxu0 %v1803_v23  ;;  %2744 = vmatprep.mubr.bf16.mxu1 %v1803_v23  ;;  %v4138_v46 = vld [vmem:[%s5430_s5 + $0x2c0] ss:$16 sps:$4 sm:$0xff]   ;;  %v4141_v47 = vld [vmem:[%s5430_s5 + $0x2c8] ss:$16 sps:$4 sm:$0xff]   ;;  %v4146_v48 = vld [vmem:[%s5430_s5 + $0x2e4] ss:$16 sps:$4 sm:$0xff]  }
 0x22f   : > { %2652 = vmatpush1.bf16.msra.mxu0 %v4108_v14  ;;  %2758 = vmatpush1.bf16.msra.mxu1 %v4111_v15  ;;  %v4149_v49 = vld [vmem:[%s5430_s5 + $0x2ec] ss:$16 sps:$4 sm:$0xff]   ;;  %v4144_v51 = vld [vmem:[%s5430_s5 + $0x2e0] ss:$16 sps:$4 sm:$0xff]   ;;  %v4147_v52 = vld [vmem:[%s5430_s5 + $0x2e8] ss:$16 sps:$4 sm:$0xff]  }
 0x230   : > { %2653 = vmatprep.subr.bf16.mxu0 %v4116_v20  ;;  %2759 = vmatprep.subr.bf16.mxu1 %v4119_v24  ;;  %v4152_v53 = vld [vmem:[%s5430_s5 + $0x304] ss:$16 sps:$4 sm:$0xff]   ;;  %v4155_v54 = vld [vmem:[%s5430_s5 + $0x30c] ss:$16 sps:$4 sm:$0xff]   ;;  %v4150_v55 = vld [vmem:[%s5430_s5 + $0x300] ss:$16 sps:$4 sm:$0xff]  }
 0x231   : > { %v4153_v56 = vld [vmem:[%s5430_s5 + $0x308] ss:$16 sps:$4 sm:$0xff]   ;;  %v4158_v57 = vld [vmem:[%s5430_s5 + $0x324] ss:$16 sps:$4 sm:$0xff]   ;;  %v4161_v58 = vld [vmem:[%s5430_s5 + $0x32c] ss:$16 sps:$4 sm:$0xff]  }
 0x232   : > { %2639 = vmatmul.mubr.bf16.gmra.mrb[20].mxu0 %v1802_v21  ;;  %2745 = vmatmul.mubr.bf16.gmra.mrb[20].mxu1 %v1802_v21  ;;  %v4156_v59 = vld [vmem:[%s5430_s5 + $0x320] ss:$16 sps:$4 sm:$0xff]   ;;  %v4159_v60 = vld [vmem:[%s5430_s5 + $0x328] ss:$16 sps:$4 sm:$0xff]   ;;  %v4164_v61 = vld [vmem:[%s5430_s5 + $0x344] ss:$16 sps:$4 sm:$0xff]  }
 0x233   : > { %2654 = vmatpush1.bf16.msra.mxu0 %v4114_v29  ;;  %2760 = vmatpush1.bf16.msra.mxu1 %v4117_v30  ;;  %v4167_v62 = vld [vmem:[%s5430_s5 + $0x34c] ss:$16 sps:$4 sm:$0xff]   ;;  %v4162_v2 = vld [vmem:[%s5430_s5 + $0x340] ss:$16 sps:$4 sm:$0xff]   ;;  %v4165_v8 = vld [vmem:[%s5430_s5 + $0x348] ss:$16 sps:$4 sm:$0xff]  }
 0x234   : > { %2681 = vmatprep.mubr.bf16.mxu0 %v1801_v11  ;;  %2787 = vmatprep.mubr.bf16.mxu1 %v1801_v11  ;;  %v4170_v9 = vld [vmem:[%s5430_s5 + $0x364] ss:$16 sps:$4 sm:$0xff]   ;;  %v4173_v10 = vld [vmem:[%s5430_s5 + $0x36c] ss:$16 sps:$4 sm:$0xff]   ;;  %v4168_v4 = vld [vmem:[%s5430_s5 + $0x360] ss:$16 sps:$4 sm:$0xff]  }
 0x235   : > { %2655 = vmatprep.subr.bf16.mxu0 %v4122_v31  ;;  %2761 = vmatprep.subr.bf16.mxu1 %v4125_v32  ;;  %v4171_v5 = vld [vmem:[%s5430_s5 + $0x368] ss:$16 sps:$4 sm:$0xff]   ;;  %v4176_v11 = vld [vmem:[%s5430_s5 + $0x384] ss:$16 sps:$4 sm:$0xff]   ;;  %v4179_v12 = vld [vmem:[%s5430_s5 + $0x38c] ss:$16 sps:$4 sm:$0xff]  }
 0x236   : > { %v4174_v13 = vld [vmem:[%s5430_s5 + $0x380] ss:$16 sps:$4 sm:$0xff]   ;;  %v4177_v6 = vld [vmem:[%s5430_s5 + $0x388] ss:$16 sps:$4 sm:$0xff]   ;;  %v4182_v7 = vld [vmem:[%s5430_s5 + $0x3a4] ss:$16 sps:$4 sm:$0xff]  }
 0x237   : > { %2656 = vmatpush1.bf16.msra.mxu0 %v4120_v33  ;;  %2762 = vmatpush1.bf16.msra.mxu1 %v4123_v34  ;;  %v4185_v14 = vld [vmem:[%s5430_s5 + $0x3ac] ss:$16 sps:$4 sm:$0xff]   ;;  %v4180_v15 = vld [vmem:[%s5430_s5 + $0x3a0] ss:$16 sps:$4 sm:$0xff]   ;;  %v4183_v16 = vld [vmem:[%s5430_s5 + $0x3a8] ss:$16 sps:$4 sm:$0xff]  }
 0x238   : > { %2657 = vmatprep.subr.bf16.mxu0 %v4128_v35  ;;  %2763 = vmatprep.subr.bf16.mxu1 %v4131_v36  ;;  %v4188_v17 = vld [vmem:[%s5430_s5 + $0x3c4] ss:$16 sps:$4 sm:$0xff]   ;;  %v4191_v18 = vld [vmem:[%s5430_s5 + $0x3cc] ss:$16 sps:$4 sm:$0xff]   ;;  %v4186_v19 = vld [vmem:[%s5430_s5 + $0x3c0] ss:$16 sps:$4 sm:$0xff]  }
 0x239   : > { %v4189_v20 = vld [vmem:[%s5430_s5 + $0x3c8] ss:$16 sps:$4 sm:$0xff]   ;;  %v4194_v21 = vld [vmem:[%s5430_s5 + $0x3e4] ss:$16 sps:$4 sm:$0xff]   ;;  %v4197_v22 = vld [vmem:[%s5430_s5 + $0x3ec] ss:$16 sps:$4 sm:$0xff]  }
 0x23a   : > { %v4192_v23 = vld [vmem:[%s5430_s5 + $0x3e0] ss:$16 sps:$4 sm:$0xff]   ;;  %v4195_v24 = vld [vmem:[%s5430_s5 + $0x3e8] ss:$16 sps:$4 sm:$0xff]  }
 0x23b   : > { %2658 = vmatpush1.bf16.msra.mxu0 %v4126_v37  ;;  %2764 = vmatpush1.bf16.msra.mxu1 %v4129_v38  ;;  %v4198_v26 = vld [vmem:[%s5432_s7 + $0x40] sm:$0xff]   ;;  %v4202_v31 = vld [vmem:[%s5432_s7 + $0x48] sm:$0xff]   ;;  %v4208_v35 = vld [vmem:[%s5432_s7 + $0x10] sm:$0xff]  }
 0x23c   : > { %2659 = vmatprep.subr.bf16.mxu0 %v4134_v39  ;;  %2765 = vmatprep.subr.bf16.mxu1 %v4137_v41  ;;  %v4199_v27 = vld [vmem:[%s5432_s7 + $0xc0] sm:$0xff]   ;;  %v4203_v32 = vld [vmem:[%s5432_s7 + $0xc8] sm:$0xff]   ;;  %v4209_v36 = vld [vmem:[%s5432_s7 + $0x90] sm:$0xff]  }
 0x23d   : > { %v4200_v29 = vld [vmem:[%s5432_s7] sm:$0xff]   ;;  %v4204_v33 = vld [vmem:[%s5432_s7 + $0x8] sm:$0xff]   ;;  %v4210_v37 = vld [vmem:[%s5432_s7 + $0x58] sm:$0xff]  }
 0x23e   : > { %v4201_v30 = vld [vmem:[%s5432_s7 + $0x80] sm:$0xff]   ;;  %v4205_v34 = vld [vmem:[%s5432_s7 + $0x88] sm:$0xff]   ;;  %v4211_v38 = vld [vmem:[%s5432_s7 + $0xd8] sm:$0xff]  }
 0x23f   : > { %2660 = vmatpush1.bf16.msra.mxu0 %v4132_v42  ;;  %2766 = vmatpush1.bf16.msra.mxu1 %v4135_v43  ;;  %v4212_v39 = vld [vmem:[%s5432_s7 + $0x18] sm:$0xff]   ;;  %v4214_v42 = vld [vmem:[%s5432_s7 + $0x60] sm:$0xff]  }
 0x240   : > { %2661 = vmatprep.subr.bf16.mxu0 %v4140_v44  ;;  %2767 = vmatprep.subr.bf16.mxu1 %v4143_v45  ;;  %v4213_v41 = vld [vmem:[%s5432_s7 + $0x98] sm:$0xff]   ;;  %v4216_v43 = vld [vmem:[%s5432_s7 + $0x20] sm:$0xff]   ;;  %v4218_v45 = vld [vmem:[%s5432_s7 + $0x68] sm:$0xff]  }
 0x241   : > { %v4217_v44 = vld [vmem:[%s5432_s7 + $0xa0] sm:$0xff]  }
 0x243   : > { %2662 = vmatpush1.bf16.msra.mxu0 %v4138_v46  ;;  %2768 = vmatpush1.bf16.msra.mxu1 %v4141_v47  ;;  %v4219_v46 = vld [vmem:[%s5432_s7 + $0xe8] sm:$0xff]  }
 0x244   : > { %2663 = vmatprep.subr.bf16.mxu0 %v4146_v48  ;;  %2769 = vmatprep.subr.bf16.mxu1 %v4149_v49  ;;  %v4220_v47 = vld [vmem:[%s5432_s7 + $0x28] sm:$0xff]   ;;  %v4222_v49 = vld [vmem:[%s5432_s7 + $0x70] sm:$0xff]  }
 0x245   : > { %v4221_v48 = vld [vmem:[%s5432_s7 + $0xa8] sm:$0xff]  }
 0x247   : > { %2664 = vmatpush1.bf16.msra.mxu0 %v4144_v51  ;;  %2770 = vmatpush1.bf16.msra.mxu1 %v4147_v52  ;;  %v4223_v51 = vld [vmem:[%s5432_s7 + $0xf0] sm:$0xff]  }
 0x248   : > { %2665 = vmatprep.subr.bf16.mxu0 %v4152_v53  ;;  %2771 = vmatprep.subr.bf16.mxu1 %v4155_v54  ;;  %v4224_v52 = vld [vmem:[%s5432_s7 + $0x30] sm:$0xff]   ;;  %v4226_v54 = vld [vmem:[%s5432_s7 + $0x78] sm:$0xff]  }
 0x249   : > { %v4225_v53 = vld [vmem:[%s5432_s7 + $0xb0] sm:$0xff]  }
 0x24b   : > { %2666 = vmatpush1.bf16.msra.mxu0 %v4150_v55  ;;  %2772 = vmatpush1.bf16.msra.mxu1 %v4153_v56  ;;  %v4227_v55 = vld [vmem:[%s5432_s7 + $0xf8] sm:$0xff]  }
 0x24c   : > { %2667 = vmatprep.subr.bf16.mxu0 %v4158_v57  ;;  %2773 = vmatprep.subr.bf16.mxu1 %v4161_v58  ;;  %v4228_v56 = vld [vmem:[%s5432_s7 + $0x38] sm:$0xff]   ;;  %v1934_v58 = vld [vmem:[%s5431_s6] sm:$0xf] }
 0x24d   : > { %v4229_v57 = vld [vmem:[%s5432_s7 + $0xb8] sm:$0xff]  }
 0x24f   : > { %2668 = vmatpush1.bf16.msra.mxu0 %v4156_v59  ;;  %2774 = vmatpush1.bf16.msra.mxu1 %v4159_v60  ;;  %v5379_v59 = vrot.slane %v1934_v58, %v880_v0  ;;  %v5383_v60 = vrot.slane %v1934_v58, %v888_v1 }
 0x250   : > { %2669 = vmatprep.subr.bf16.mxu0 %v4164_v61  ;;  %2775 = vmatprep.subr.bf16.mxu1 %v4167_v62  ;;  %v5387_v61 = vrot.slane %v1934_v58, %v884_v3  ;;  %v5391_v62 = vrot.slane %v1934_v58, %v892_v50 }
 0x253   : > { %2670 = vmatpush1.bf16.msra.mxu0 %v4162_v2  ;;  %2776 = vmatpush1.bf16.msra.mxu1 %v4165_v8 }
 0x254   : > { %2671 = vmatprep.subr.bf16.mxu0 %v4170_v9  ;;  %2777 = vmatprep.subr.bf16.mxu1 %v4173_v10 }
 0x257   : > { %2672 = vmatpush1.bf16.msra.mxu0 %v4168_v4  ;;  %2778 = vmatpush1.bf16.msra.mxu1 %v4171_v5 }
 0x258   : > { %2673 = vmatprep.subr.bf16.mxu0 %v4176_v11  ;;  %2779 = vmatprep.subr.bf16.mxu1 %v4179_v12 }
 0x25b   : > { %2674 = vmatpush1.bf16.msra.mxu0 %v4174_v13  ;;  %2780 = vmatpush1.bf16.msra.mxu1 %v4177_v6 }
 0x25c   : > { %2675 = vmatprep.subr.bf16.mxu0 %v4182_v7  ;;  %2781 = vmatprep.subr.bf16.mxu1 %v4185_v14 }
 0x25f   : > { %2676 = vmatpush1.bf16.msra.mxu0 %v4180_v15  ;;  %2782 = vmatpush1.bf16.msra.mxu1 %v4183_v16 }
 0x260   : > { %2677 = vmatprep.subr.bf16.mxu0 %v4188_v17  ;;  %2783 = vmatprep.subr.bf16.mxu1 %v4191_v18 }
 0x263   : > { %2678 = vmatpush1.bf16.msra.mxu0 %v4186_v19  ;;  %2784 = vmatpush1.bf16.msra.mxu1 %v4189_v20 }
 0x264   : > { %2679 = vmatprep.subr.bf16.mxu0 %v4194_v21  ;;  %2785 = vmatprep.subr.bf16.mxu1 %v4197_v22 }
 0x267   : > { %2680 = vmatpush1.bf16.msra.mxu0 %v4192_v23  ;;  %2786 = vmatpush1.bf16.msra.mxu1 %v4195_v24 }
 0x268   : > { %3635 = vmatprep.subr.bf16.mxu0 %v4198_v26  ;;  %3663 = vmatprep.subr.bf16.mxu1 %v4199_v27 }
 0x26a   : > { %2682 = vmatmul.mubr.bf16.vlgmr.msra.gmra.mrb[16].mxu0 %v5062_v40  ;;  %2788 = vmatmul.mubr.bf16.vlgmr.msra.gmra.mrb[16].mxu1 %v5062_v40  ;;  %v4206_v40 = vld [vmem:[%s5432_s7 + $0x50] sm:$0xff]  }
 0x26b   : > { %2691 = vmatprep.mubr.bf16.mxu0 %v5104_v25  ;;  %2797 = vmatprep.mubr.bf16.mxu1 %v5104_v25  ;;  %v4207_v25 = vld [vmem:[%s5432_s7 + $0xd0] sm:$0xff]  }
 0x26c   : > { %3636 = vmatpush3.bf16.msra.mxu0 %v4200_v29  ;;  %3664 = vmatpush3.bf16.msra.mxu1 %v4201_v30 }
 0x26d   : > { %3637 = vmatprep.subr.bf16.mxu0 %v4202_v31  ;;  %3665 = vmatprep.subr.bf16.mxu1 %v4203_v32 }
 0x270   : > { %3638 = vmatpush3.bf16.msra.mxu0 %v4204_v33  ;;  %3666 = vmatpush3.bf16.msra.mxu1 %v4205_v34 }
 0x271   : > { %3639 = vmatprep.subr.bf16.mxu0 %v4206_v40  ;;  %3667 = vmatprep.subr.bf16.mxu1 %v4207_v25 }
 0x272   : > { %2692 = vmatmul.mubr.bf16.gmra.mrb[20].mxu0 %v5108_v28  ;;  %2798 = vmatmul.mubr.bf16.gmra.mrb[20].mxu1 %v5108_v28  ;;  %v4215_v28 = vld [vmem:[%s5432_s7 + $0xe0] sm:$0xff]  }
 0x274   : > { %3640 = vmatpush3.bf16.msra.mxu0 %v4208_v35  ;;  %3668 = vmatpush3.bf16.msra.mxu1 %v4209_v36 }
 0x275   : > { %3641 = vmatprep.subr.bf16.mxu0 %v4210_v37  ;;  %3669 = vmatprep.subr.bf16.mxu1 %v4211_v38 }
 0x278   : > { %3642 = vmatpush3.bf16.msra.mxu0 %v4212_v39  ;;  %3670 = vmatpush3.bf16.msra.mxu1 %v4213_v41 }
 0x279   : > { %3643 = vmatprep.subr.bf16.mxu0 %v4214_v42  ;;  %3671 = vmatprep.subr.bf16.mxu1 %v4215_v28 }
 0x27c   : > { %3644 = vmatpush3.bf16.msra.mxu0 %v4216_v43  ;;  %3672 = vmatpush3.bf16.msra.mxu1 %v4217_v44 }
 0x27d   : > { %3645 = vmatprep.subr.bf16.mxu0 %v4218_v45  ;;  %3673 = vmatprep.subr.bf16.mxu1 %v4219_v46 }
 0x280   : > { %3646 = vmatpush3.bf16.msra.mxu0 %v4220_v47  ;;  %3674 = vmatpush3.bf16.msra.mxu1 %v4221_v48 }
 0x281   : > { %3647 = vmatprep.subr.bf16.mxu0 %v4222_v49  ;;  %3675 = vmatprep.subr.bf16.mxu1 %v4223_v51 }
 0x284   : > { %3648 = vmatpush3.bf16.msra.mxu0 %v4224_v52  ;;  %3676 = vmatpush3.bf16.msra.mxu1 %v4225_v53 }
 0x285   : > { %3649 = vmatprep.subr.bf16.mxu0 %v4226_v54  ;;  %3677 = vmatprep.subr.bf16.mxu1 %v4227_v55 }
 0x288   : > { %3650 = vmatpush3.bf16.msra.mxu0 %v4228_v56  ;;  %3678 = vmatpush3.bf16.msra.mxu1 %v4229_v57 }
 0x33d   : > { %v2683_v2 = vpop.f32.mrb[16].mxu0  ;;  %v2789_v8 = vpop.f32.mrb[16].mxu1 }
 0x33e   : > { %v3707_v9 = vadd.f32 %v2683_v2, %v5379_v59  ;;  %v3715_v10 = vadd.f32 %v2789_v8, %v5383_v60  ;;  %v2685_v0 = vpop.f32.mrb[17].mxu0  ;;  %v2791_v4 = vpop.f32.mrb[17].mxu1 }
 0x33f   : > { %v3708_v5 = vadd.f32 %v2685_v0, %v5387_v61  ;;  %v3716_v1 = vadd.f32 %v2791_v4, %v5391_v62  ;;  %v2687_v11 = vpop.f32.mrb[18].mxu0  ;;  %v2793_v12 = vpop.f32.mrb[18].mxu1 }
 0x340   : > { %vm2808_vm0 = vcmp.gt.f32.partialorder %v3707_v9, 0.0  ;;  %v2824_v3 = vmul.f32 0.2, %v3707_v9  ;;  %vm2810_vm1 = vcmp.gt.f32.partialorder %v3715_v10, 0.0  ;;  %v2826_v63 = vmul.f32 0.2, %v3715_v10 }
 0x341   : > { %vm2809_vm2 = vcmp.gt.f32.partialorder %v3708_v5, 0.0  ;;  %v2825_v50 = vmul.f32 0.2, %v3708_v5  ;;  %vm2811_vm3 = vcmp.gt.f32.partialorder %v3716_v1, 0.0  ;;  %v2827_v13 = vmul.f32 0.2, %v3716_v1 }
 0x342   : > { %v3709_v6 = vadd.f32 %v2687_v11, %v5379_v59  ;;  %v3717_v7 = vadd.f32 %v2793_v12, %v5383_v60  ;;  %v2689_v14 = vpop.f32.mrb[19].mxu0  ;;  %v2795_v15 = vpop.f32.mrb[19].mxu1  ;;  %v2840_v16 = vsel %vm2808_vm0, %v3707_v9, %v2824_v3  ;;  %v2842_v17 = vsel %vm2810_vm1, %v3715_v10, %v2826_v63  ;;  %v3599_v3 = vld [vmem:[%s5433_s8] ss:$0 sm:$0xff] }
 0x343   : > { %v3710_v18 = vadd.f32 %v2689_v14, %v5387_v61  ;;  %v3718_v19 = vadd.f32 %v2795_v15, %v5391_v62  ;;  %v2841_v30 = vsel %vm2809_vm2, %v3708_v5, %v2825_v50  ;;  %v2843_v31 = vsel %vm2811_vm3, %v3716_v1, %v2827_v13 }
 0x344   : > { %vm2812_vm4 = vcmp.gt.f32.partialorder %v3709_v6, 0.0  ;;  %v2828_v20 = vmul.f32 0.2, %v3709_v6  ;;  %vm2814_vm5 = vcmp.gt.f32.partialorder %v3717_v7, 0.0  ;;  %v2830_v21 = vmul.f32 0.2, %v3717_v7 }
 0x345   : > { %vm2813_vm6 = vcmp.gt.f32.partialorder %v3710_v18, 0.0  ;;  %v2829_v22 = vmul.f32 0.2, %v3710_v18  ;;  %vm2815_vm7 = vcmp.gt.f32.partialorder %v3718_v19, 0.0  ;;  %v2831_v23 = vmul.f32 0.2, %v3718_v19 }
 0x346   : > { %v2844_v24 = vsel %vm2812_vm4, %v3709_v6, %v2828_v20  ;;  %v2846_v26 = vsel %vm2814_vm5, %v3717_v7, %v2830_v21  ;;  %v2693_v27 = vpop.f32.mrb[20].mxu0  ;;  %v2799_v29 = vpop.f32.mrb[20].mxu1 }
 0x347   : > { %v2856_v32 = vpack.c.bf16 %v2844_v24, %v2840_v16  ;;  %v2858_v33 = vpack.c.bf16 %v2846_v26, %v2842_v17  ;;  %v3711_v34 = vadd.f32 %v2693_v27, %v5379_v59  ;;  %v3719_v40 = vadd.f32 %v2799_v29, %v5383_v60  ;;  %v2695_v25 = vpop.f32.mrb[21].mxu0  ;;  %v2801_v35 = vpop.f32.mrb[21].mxu1 }
 0x348   : > { %v3712_v36 = vadd.f32 %v2695_v25, %v5387_v61  ;;  %v3720_v37 = vadd.f32 %v2801_v35, %v5391_v62  ;;  %v2697_v38 = vpop.f32.mrb[22].mxu0  ;;  %v2803_v39 = vpop.f32.mrb[22].mxu1  ;;  %v2845_v41 = vsel %vm2813_vm6, %v3710_v18, %v2829_v22  ;;  %v2847_v42 = vsel %vm2815_vm7, %v3718_v19, %v2831_v23 }
 0x349   : > { %vm2816_vm8 = vcmp.gt.f32.partialorder %v3711_v34, 0.0  ;;  %v2832_v28 = vmul.f32 0.2, %v3711_v34  ;;  %vm2818_vm9 = vcmp.gt.f32.partialorder %v3719_v40, 0.0  ;;  %v2834_v43 = vmul.f32 0.2, %v3719_v40 }
 0x34a   : > { %vm2817_vm10 = vcmp.gt.f32.partialorder %v3712_v36, 0.0  ;;  %v2833_v44 = vmul.f32 0.2, %v3712_v36  ;;  %vm2819_vm11 = vcmp.gt.f32.partialorder %v3720_v37, 0.0  ;;  %v2835_v45 = vmul.f32 0.2, %v3720_v37 }
 0x34b   : > { %v3713_v46 = vadd.f32 %v2697_v38, %v5379_v59  ;;  %v3721_v47 = vadd.f32 %v2803_v39, %v5383_v60  ;;  %v2699_v48 = vpop.f32.mrb[23].mxu0  ;;  %v2805_v49 = vpop.f32.mrb[23].mxu1  ;;  %v2857_v51 = vpack.c.bf16 %v2845_v41, %v2841_v30  ;;  %v2859_v52 = vpack.c.bf16 %v2847_v42, %v2843_v31 }
 0x34c   : > { %v3714_v53 = vadd.f32 %v2699_v48, %v5387_v61  ;;  %v3722_v54 = vadd.f32 %v2805_v49, %v5391_v62  ;;  %v2849_v55 = vsel %vm2817_vm10, %v3712_v36, %v2833_v44  ;;  %v2851_v56 = vsel %vm2819_vm11, %v3720_v37, %v2835_v45 }
 0x34d   : > { %vm2820_vm12 = vcmp.gt.f32.partialorder %v3713_v46, 0.0  ;;  %v2836_v57 = vmul.f32 0.2, %v3713_v46  ;;  %vm2822_vm13 = vcmp.gt.f32.partialorder %v3721_v47, 0.0  ;;  %v2838_v58 = vmul.f32 0.2, %v3721_v47  ;;  %3159 = vmatprep.mubr.bf16.mxu0 %v2857_v51  ;;  %3208 = vmatprep.mubr.bf16.mxu1 %v2859_v52 }
 0x34e   : > { %vm2821_vm14 = vcmp.gt.f32.partialorder %v3714_v53, 0.0  ;;  %v2837_v59 = vmul.f32 0.2, %v3714_v53  ;;  %vm2823_vm15 = vcmp.gt.f32.partialorder %v3722_v54, 0.0  ;;  %v2839_v60 = vmul.f32 0.2, %v3722_v54  ;;  %3160 = vmatmul.mubr.bf16.vlgmr.msra.gmra.mrb[24].mxu0 %v2856_v32  ;;  %3209 = vmatmul.mubr.bf16.vlgmr.msra.gmra.mrb[24].mxu1 %v2858_v33 }
 0x34f   : > { %v2848_v2 = vsel %vm2816_vm8, %v3711_v34, %v2832_v28  ;;  %v2852_v8 = vsel %vm2820_vm12, %v3713_v46, %v2836_v57  ;;  %v2850_v61 = vsel %vm2818_vm9, %v3719_v40, %v2834_v43  ;;  %v2854_v62 = vsel %vm2822_vm13, %v3721_v47, %v2838_v58 }
 0x350   : > { %v2853_v9 = vsel %vm2821_vm14, %v3714_v53, %v2837_v59  ;;  %v2855_v10 = vsel %vm2823_vm15, %v3722_v54, %v2839_v60  ;;  %v2860_v0 = vpack.c.bf16 %v2852_v8, %v2848_v2  ;;  %v2862_v4 = vpack.c.bf16 %v2854_v62, %v2850_v61 }
 0x351   : > { %v2861_v5 = vpack.c.bf16 %v2853_v9, %v2849_v55  ;;  %v2863_v1 = vpack.c.bf16 %v2855_v10, %v2851_v56 }
 0x353   : > { %3167 = vmatprep.mubr.bf16.mxu0 %v2861_v5  ;;  %3216 = vmatprep.mubr.bf16.mxu1 %v2863_v1 }
 0x356   : > { %3168 = vmatmul.mubr.bf16.gmra.mrb[28].mxu0 %v2860_v0  ;;  %3217 = vmatmul.mubr.bf16.gmra.mrb[28].mxu1 %v2862_v4 }
 0x421   : > { %v3651_v11 = vpop.f32.mrb[24].mxu0  ;;  %v3679_v12 = vpop.f32.mrb[24].mxu1 }
 0x422   : > { %v3652_v63 = vpop.f32.mrb[25].mxu0  ;;  %v3680_v50 = vpop.f32.mrb[25].mxu1 }
 0x423   : > { %v3653_v13 = vadd.f32 %v3652_v63, %v3651_v11  ;;  %v3681_v6 = vadd.f32 %v3680_v50, %v3679_v12  ;;  %v3654_v7 = vpop.f32.mrb[26].mxu0  ;;  %v3682_v14 = vpop.f32.mrb[26].mxu1 }
 0x424   : > { %v3655_v15 = vpop.f32.mrb[27].mxu0  ;;  %v3683_v16 = vpop.f32.mrb[27].mxu1 }
 0x425   : > { %v3162_v17 = vadd.f32 %v3653_v13, %v3599_v3  ;;  %v3656_v18 = vadd.f32 %v3655_v15, %v3654_v7  ;;  %v3684_v19 = vadd.f32 %v3683_v16, %v3682_v14 }
 0x427   : > { %v3211_v20 = vadd.f32 %v3681_v6, %v3162_v17  ;;  %v3165_v21 = vadd.f32 %v3656_v18, %v3599_v3 }
 0x429   : > { %3225 = vst [vmem:[%s359_s25] sm:$0xff] %v3211_v20  ;;  %v3214_v22 = vadd.f32 %v3684_v19, %v3165_v21  ;;  %v3657_v23 = vpop.f32.mrb[28].mxu0  ;;  %v3685_v24 = vpop.f32.mrb[28].mxu1 }
 0x42a   : > { %v3658_v26 = vpop.f32.mrb[29].mxu0  ;;  %v3686_v27 = vpop.f32.mrb[29].mxu1 }
 0x42b   : > { %3226 = vst [vmem:[%s359_s25 + $0x8] sm:$0xff] %v3214_v22  ;;  %v3659_v29 = vadd.f32 %v3658_v26, %v3657_v23  ;;  %v3687_v30 = vadd.f32 %v3686_v27, %v3685_v24  ;;  %v3660_v31 = vpop.f32.mrb[30].mxu0  ;;  %v3688_v32 = vpop.f32.mrb[30].mxu1 }
 0x42c   : > { %v3661_v33 = vpop.f32.mrb[31].mxu0  ;;  %v3689_v34 = vpop.f32.mrb[31].mxu1 }
 0x42d   : > { %v3170_v40 = vadd.f32 %v3659_v29, %v3599_v3  ;;  %v3662_v25 = vadd.f32 %v3661_v33, %v3660_v31  ;;  %v3690_v35 = vadd.f32 %v3689_v34, %v3688_v32 }
 0x42f   : > { %v3219_v36 = vadd.f32 %v3687_v30, %v3170_v40  ;;  %v3173_v37 = vadd.f32 %v3662_v25, %v3599_v3 }
 0x431   : > { %3227 = vst [vmem:[%s359_s25 + $0x10] sm:$0xff] %v3219_v36  ;;  %v3222_v38 = vadd.f32 %v3690_v35, %v3173_v37 }
 0x433   : > { %3228 = vst [vmem:[%s359_s25 + $0x18] sm:$0xff] %v3222_v38 }
 0x434 PF: > { %s19_s30 = sadd.s32 1, %s4236_s30  }
 0x435   : > { %p16_p4 = scmp.ge.s32.totalorder %s19_s30, 4  }
 0x437   :  { %18 = sbr.rel (!%p16_p4) target bundleno = 1 (0x1), region = 89 }

</bundles_post_ra>
